<compile_context>
chip_gen: v6e
topology: v6e:2x2x1
jax: 0.10.0
libtpu: 0.0.40
codegen_flags: <defaults>
</compile_context>

<pallas_src>
import jax
import jax.numpy as jnp
from jax.experimental import pallas as pl
from jax.experimental.pallas import tpu as pltpu

NB_STATES = 12
NB_ACTIONS = 13
H1 = H2 = H3 = 512
LEAKY_SLOPE = 0.01  # torch.nn.LeakyReLU default negative_slope


def _leaky_relu(x):
    return jnp.where(x > 0, x, LEAKY_SLOPE * x)


def dqn_kernel(x_ref,
               w1_ref, b1_ref, w2_ref, b2_ref,
               w3_ref, b3_ref, w4_ref, b4_ref,
               out_ref):
    # x stays f32: the `x == 0` mask below needs exact-zero semantics.
    x = x_ref[...]                                                      # (TB, 12) f32
    tb = x.shape[0]

    # bf16 operands into the MXU, f32 accumulation, f32 bias + LeakyReLU epilogue,
    # then re-materialize the activation in bf16 so only ONE copy stays live into
    # the next dot (halves hidden-state VMEM at large TB).
    h = jnp.dot(x.astype(jnp.bfloat16), w1_ref[...],
                preferred_element_type=jnp.float32) + b1_ref[...]
    h = _leaky_relu(h).astype(jnp.bfloat16)
    h = jnp.dot(h, w2_ref[...],
                preferred_element_type=jnp.float32) + b2_ref[...]
    h = _leaky_relu(h).astype(jnp.bfloat16)
    h = jnp.dot(h, w3_ref[...],
                preferred_element_type=jnp.float32) + b3_ref[...]
    h = _leaky_relu(h).astype(jnp.bfloat16)
    out = jnp.dot(h, w4_ref[...],
                  preferred_element_type=jnp.float32) + b4_ref[...]      # (TB, 13) f32

    # torch: x_mask = cat(x, ones); out[x_mask == 0] = -5.0 ; out[:, 12] = 0.2
    # The appended ones-column (index 12) can never be zero, so only the first 12
    # output columns are subject to the mask; column 12 is forced to 0.2 afterwards.
    # Build the full (TB, 13) result in registers and do ONE full-tile store
    # (13 lanes < 128 -> a single masked vst instead of two).
    masked = jnp.where(x == 0.0, jnp.float32(-5.0), out[:, :NB_STATES])  # (TB, 12)
    last_col = jnp.full((tb, 1), 0.2, jnp.float32)                       # (TB, 1)
    out_ref[...] = jnp.concatenate([masked, last_col], axis=1)


def _round_up(n, m):
    return ((n + m - 1) // m) * m


def _cdiv(a, b):
    return -(-a // b)


def _pick_batch_tile(batch, *, max_tile=2048, num_cores=2, min_tile=8):
    """Pick a sublane-aligned batch tile.

    Goals (per perf review):
      * large batches: TB up to ~2048 so per-step MXU work (~2.4 us) dwarfs the
        ~0.35 us per-grid-step pipeline overhead;
      * mid-size batches: >=2 balanced grid steps so the "parallel" batch axis
        actually feeds both TensorCores on v7x;
      * tiny batches: smallest 8-row-aligned tile.
    """
    batch_r = _round_up(max(batch, 1), min_tile)
    if batch_r <= min_tile:
        return min_tile
    if batch_r <= max_tile:
        # Enough rows to split evenly across cores? Then make the grid 2 (or more)
        # balanced steps; otherwise a single tile covering the whole batch.
        if batch_r >= 2 * min_tile * num_cores:
            return _round_up(_cdiv(batch, num_cores), min_tile)
        return batch_r
    # Big batch: largest tile <= max_tile with a core-balanced step count.
    steps = _cdiv(batch, max_tile)
    steps = _round_up(steps, num_cores)
    return _round_up(_cdiv(batch, steps), min_tile)


def _vmem_limit_bytes(tb):
    """Only override scoped VMEM when the tile is big (covers v5e's 16 MiB default)."""
    if tb <= 256:
        return None
    act = tb * H1 * (4 + 2)                    # one f32 dot output + one bf16 activation
    weights = 2 * (NB_STATES * H1 + H1 * H2 + H2 * H3 + H3 * NB_ACTIONS) \
        + 4 * (H1 + H2 + H3 + NB_ACTIONS)      # resident bf16 weights + f32 biases
    io = 2 * 2 * tb * (NB_STATES + NB_ACTIONS) * 4  # double-buffered x / out tiles
    est = act + weights + io
    return int(min(96 * 1024 * 1024, max(32 * 1024 * 1024, 2 * est)))


def dqn_forward(x, params, *, max_tile=2048, num_cores=2):
    """x: (B, 12) float32. params: dict of bf16 weights / f32 biases. Returns (B, 13) f32."""
    B = x.shape[0]
    TB = _pick_batch_tile(B, max_tile=max_tile, num_cores=num_cores)
    grid = (pl.cdiv(B, TB),)

    row_map = lambda i: (i, 0)    # batch-tiled arrays
    const_map = lambda i: (0, 0)  # weights/biases: loaded once, resident across the grid

    w1, b1 = params["w1"], params["b1"]
    w2, b2 = params["w2"], params["b2"]
    w3, b3 = params["w3"], params["b3"]
    w4, b4 = params["w4"], params["b4"]

    # Constant index_map => no need for double-buffering these: single-buffer them.
    const_kwargs = {}
    if hasattr(pl, "Buffered"):
        const_kwargs["pipeline_mode"] = pl.Buffered(1)

    def const_spec(a):
        return pl.BlockSpec(a.shape, const_map, **const_kwargs)

    in_specs = [
        pl.BlockSpec((TB, NB_STATES), row_map),
        const_spec(w1), const_spec(b1),
        const_spec(w2), const_spec(b2),
        const_spec(w3), const_spec(b3),
        const_spec(w4), const_spec(b4),
    ]
    out_specs = pl.BlockSpec((TB, NB_ACTIONS), row_map)

    # Advisory cost estimate so XLA doesn't treat the call as zero-cost.
    flops = 2 * B * (NB_STATES * H1 + H1 * H2 + H2 * H3 + H3 * NB_ACTIONS)
    weight_bytes = 2 * (NB_STATES * H1 + H1 * H2 + H2 * H3 + H3 * NB_ACTIONS) \
        + 4 * (H1 + H2 + H3 + NB_ACTIONS)
    bytes_accessed = 4 * B * NB_STATES + 4 * B * NB_ACTIONS + weight_bytes
    cost = pl.CostEstimate(flops=flops, transcendentals=0,
                           bytes_accessed=bytes_accessed)

    cp_kwargs = dict(dimension_semantics=("parallel",))
    vmem_limit = _vmem_limit_bytes(TB)
    if vmem_limit is not None:
        cp_kwargs["vmem_limit_bytes"] = vmem_limit

    return pl.pallas_call(
        dqn_kernel,
        out_shape=jax.ShapeDtypeStruct((B, NB_ACTIONS), jnp.float32),
        grid=grid,
        in_specs=in_specs,
        out_specs=out_specs,
        compiler_params=pltpu.CompilerParams(**cp_kwargs),
        cost_estimate=cost,
    )(x, w1, b1, w2, b2, w3, b3, w4, b4)


def init_params(key):
    """Init mimicking torch.nn.Linear default (uniform +-1/sqrt(fan_in)).

    Weights are stored (in, out) in bf16 (kernel computes x @ W); biases stay f32.
    """
    def linear(k, fan_in, fan_out):
        kw, kb = jax.random.split(k)
        bound = 1.0 / jnp.sqrt(jnp.float32(fan_in))
        w = jax.random.uniform(kw, (fan_in, fan_out), jnp.float32, -bound, bound)
        b = jax.random.uniform(kb, (1, fan_out), jnp.float32, -bound, bound)
        return w.astype(jnp.bfloat16), b

    k1, k2, k3, k4 = jax.random.split(key, 4)
    w1, b1 = linear(k1, NB_STATES, H1)
    w2, b2 = linear(k2, H1, H2)
    w3, b3 = linear(k3, H2, H3)
    w4, b4 = linear(k4, H3, NB_ACTIONS)
    return dict(w1=w1, b1=b1, w2=w2, b2=b2, w3=w3, b3=b3, w4=w4, b4=b4)


def dqn_reference(x, params):
    """Pure-JAX reference with the same bf16-operand / f32-accumulate recipe."""
    def layer(h, w, b, act):
        o = jnp.dot(h.astype(jnp.bfloat16), w,
                    preferred_element_type=jnp.float32) + b
        return _leaky_relu(o) if act else o

    h = layer(x, params["w1"], params["b1"], True)
    h = layer(h, params["w2"], params["b2"], True)
    h = layer(h, params["w3"], params["b3"], True)
    out = layer(h, params["w4"], params["b4"], False)
    x_mask = jnp.concatenate([x, jnp.ones((x.shape[0], 1), jnp.float32)], axis=1)
    out = jnp.where(x_mask == 0.0, jnp.float32(-5.0), out)
    out = out.at[:, NB_ACTIONS - 1].set(0.2)
    return out


if __name__ == "__main__":
    key = jax.random.PRNGKey(0)
    kp, kx = jax.random.split(key)
    params = init_params(kp)

    # Two batch sizes: B=8 exercises the single-tile path, B=300 exercises the
    # multi-step (balanced 2-tile) grid with a ragged last block.
    for B in (8, 300):
        x = jax.random.normal(jax.random.fold_in(kx, B), (B, NB_STATES), jnp.float32)
        # make a few entries exactly zero so the mask path (out[x_mask==0] = -5) runs
        x = x.at[0, 3].set(0.0).at[2, 7].set(0.0).at[5, 0].set(0.0)

        out = dqn_forward(x, params)
        jax.block_until_ready(out)

        assert out.shape == (B, NB_ACTIONS)
        out_np = jax.device_get(out)
        # exact-constant semantics checks
        assert (out_np[:, NB_ACTIONS - 1] == 0.2).all()
        assert out_np[0, 3] == -5.0 and out_np[2, 7] == -5.0 and out_np[5, 0] == -5.0
        # numerical check against the pure-JAX reference (same bf16 recipe)
        ref = jax.device_get(dqn_reference(x, params))
        assert jnp.allclose(out_np, ref, atol=5e-2, rtol=5e-2)

    print("KERNEL_OK")
</pallas_src>

<mosaic_0001>
module attributes {stable_mosaic.version = 11 : i64} {
  func.func @dqn_kernel(%arg0: i32, %arg1: memref<8x12xf32, #tpu.memory_space<vmem>>, %arg2: memref<12x512xbf16, #tpu.memory_space<vmem>>, %arg3: memref<1x512xf32, #tpu.memory_space<vmem>>, %arg4: memref<512x512xbf16, #tpu.memory_space<vmem>>, %arg5: memref<1x512xf32, #tpu.memory_space<vmem>>, %arg6: memref<512x512xbf16, #tpu.memory_space<vmem>>, %arg7: memref<1x512xf32, #tpu.memory_space<vmem>>, %arg8: memref<512x13xbf16, #tpu.memory_space<vmem>>, %arg9: memref<1x13xf32, #tpu.memory_space<vmem>>, %arg10: memref<8x13xf32, #tpu.memory_space<vmem>>) attributes {dimension_semantics = [#tpu.dimension_semantics<parallel>], iteration_bounds = array<i64: 1>, scalar_prefetch = 0 : i64, scratch_operands = 0 : i64, tpu.core_type = #tpu.core_type<tc>, window_params = [{transform_indices = @transform_0, window_bounds = array<i64: 8, 12>}, {pipeline_mode = #tpu.pipeline_mode<synchronous>, transform_indices = @transform_1, window_bounds = array<i64: 12, 512>}, {pipeline_mode = #tpu.pipeline_mode<synchronous>, transform_indices = @transform_2, window_bounds = array<i64: 1, 512>}, {pipeline_mode = #tpu.pipeline_mode<synchronous>, transform_indices = @transform_3, window_bounds = array<i64: 512, 512>}, {pipeline_mode = #tpu.pipeline_mode<synchronous>, transform_indices = @transform_4, window_bounds = array<i64: 1, 512>}, {pipeline_mode = #tpu.pipeline_mode<synchronous>, transform_indices = @transform_5, window_bounds = array<i64: 512, 512>}, {pipeline_mode = #tpu.pipeline_mode<synchronous>, transform_indices = @transform_6, window_bounds = array<i64: 1, 512>}, {pipeline_mode = #tpu.pipeline_mode<synchronous>, transform_indices = @transform_7, window_bounds = array<i64: 512, 13>}, {pipeline_mode = #tpu.pipeline_mode<synchronous>, transform_indices = @transform_8, window_bounds = array<i64: 1, 13>}, {transform_indices = @transform_9, window_bounds = array<i64: 8, 13>}]} {
    %c0 = arith.constant 0 : index
    %c0_0 = arith.constant 0 : index
    %0 = vector.load %arg1[%c0, %c0_0] : memref<8x12xf32, #tpu.memory_space<vmem>>, vector<8x12xf32>
    %1 = arith.truncf %0 : vector<8x12xf32> to vector<8x12xbf16>
    %c0_1 = arith.constant 0 : index
    %c0_2 = arith.constant 0 : index
    %2 = vector.load %arg2[%c0_1, %c0_2] : memref<12x512xbf16, #tpu.memory_space<vmem>>, vector<12x512xbf16>
    %cst = arith.constant dense<0.000000e+00> : vector<8x512xf32>
    %3 = tpu.matmul %1, %2, %cst {dimension_numbers = #tpu.dot_dimension_numbers<[1], [0], [0], [1], [0, 0, 1, 1], [], []>} : vector<8x12xbf16>, vector<12x512xbf16>, vector<8x512xf32> -> vector<8x512xf32>
    %c0_3 = arith.constant 0 : index
    %c0_4 = arith.constant 0 : index
    %4 = vector.load %arg3[%c0_3, %c0_4] : memref<1x512xf32, #tpu.memory_space<vmem>>, vector<1x512xf32>
    %5 = vector.broadcast %4 : vector<1x512xf32> to vector<8x512xf32>
    %6 = arith.addf %3, %5 : vector<8x512xf32>
    %cst_5 = arith.constant 0.000000e+00 : f32
    %7 = vector.broadcast %cst_5 : f32 to vector<8x512xf32>
    %8 = arith.cmpf ogt, %6, %7 : vector<8x512xf32>
    %cst_6 = arith.constant 0.00999999977 : f32
    %9 = vector.broadcast %cst_6 : f32 to vector<8x512xf32>
    %10 = arith.mulf %9, %6 : vector<8x512xf32>
    %11 = arith.select %8, %6, %10 : vector<8x512xi1>, vector<8x512xf32>
    %12 = arith.truncf %11 : vector<8x512xf32> to vector<8x512xbf16>
    %c0_7 = arith.constant 0 : index
    %c0_8 = arith.constant 0 : index
    %13 = vector.load %arg4[%c0_7, %c0_8] : memref<512x512xbf16, #tpu.memory_space<vmem>>, vector<512x512xbf16>
    %cst_9 = arith.constant dense<0.000000e+00> : vector<8x512xf32>
    %14 = tpu.matmul %12, %13, %cst_9 {dimension_numbers = #tpu.dot_dimension_numbers<[1], [0], [0], [1], [0, 0, 1, 1], [], []>} : vector<8x512xbf16>, vector<512x512xbf16>, vector<8x512xf32> -> vector<8x512xf32>
    %c0_10 = arith.constant 0 : index
    %c0_11 = arith.constant 0 : index
    %15 = vector.load %arg5[%c0_10, %c0_11] : memref<1x512xf32, #tpu.memory_space<vmem>>, vector<1x512xf32>
    %16 = vector.broadcast %15 : vector<1x512xf32> to vector<8x512xf32>
    %17 = arith.addf %14, %16 : vector<8x512xf32>
    %cst_12 = arith.constant 0.000000e+00 : f32
    %18 = vector.broadcast %cst_12 : f32 to vector<8x512xf32>
    %19 = arith.cmpf ogt, %17, %18 : vector<8x512xf32>
    %cst_13 = arith.constant 0.00999999977 : f32
    %20 = vector.broadcast %cst_13 : f32 to vector<8x512xf32>
    %21 = arith.mulf %20, %17 : vector<8x512xf32>
    %22 = arith.select %19, %17, %21 : vector<8x512xi1>, vector<8x512xf32>
    %23 = arith.truncf %22 : vector<8x512xf32> to vector<8x512xbf16>
    %c0_14 = arith.constant 0 : index
    %c0_15 = arith.constant 0 : index
    %24 = vector.load %arg6[%c0_14, %c0_15] : memref<512x512xbf16, #tpu.memory_space<vmem>>, vector<512x512xbf16>
    %cst_16 = arith.constant dense<0.000000e+00> : vector<8x512xf32>
    %25 = tpu.matmul %23, %24, %cst_16 {dimension_numbers = #tpu.dot_dimension_numbers<[1], [0], [0], [1], [0, 0, 1, 1], [], []>} : vector<8x512xbf16>, vector<512x512xbf16>, vector<8x512xf32> -> vector<8x512xf32>
    %c0_17 = arith.constant 0 : index
    %c0_18 = arith.constant 0 : index
    %26 = vector.load %arg7[%c0_17, %c0_18] : memref<1x512xf32, #tpu.memory_space<vmem>>, vector<1x512xf32>
    %27 = vector.broadcast %26 : vector<1x512xf32> to vector<8x512xf32>
    %28 = arith.addf %25, %27 : vector<8x512xf32>
    %cst_19 = arith.constant 0.000000e+00 : f32
    %29 = vector.broadcast %cst_19 : f32 to vector<8x512xf32>
    %30 = arith.cmpf ogt, %28, %29 : vector<8x512xf32>
    %cst_20 = arith.constant 0.00999999977 : f32
    %31 = vector.broadcast %cst_20 : f32 to vector<8x512xf32>
    %32 = arith.mulf %31, %28 : vector<8x512xf32>
    %33 = arith.select %30, %28, %32 : vector<8x512xi1>, vector<8x512xf32>
    %34 = arith.truncf %33 : vector<8x512xf32> to vector<8x512xbf16>
    %c0_21 = arith.constant 0 : index
    %c0_22 = arith.constant 0 : index
    %35 = vector.load %arg8[%c0_21, %c0_22] : memref<512x13xbf16, #tpu.memory_space<vmem>>, vector<512x13xbf16>
    %cst_23 = arith.constant dense<0.000000e+00> : vector<8x13xf32>
    %36 = tpu.matmul %34, %35, %cst_23 {dimension_numbers = #tpu.dot_dimension_numbers<[1], [0], [0], [1], [0, 0, 1, 1], [], []>} : vector<8x512xbf16>, vector<512x13xbf16>, vector<8x13xf32> -> vector<8x13xf32>
    %c0_24 = arith.constant 0 : index
    %c0_25 = arith.constant 0 : index
    %37 = vector.load %arg9[%c0_24, %c0_25] : memref<1x13xf32, #tpu.memory_space<vmem>>, vector<1x13xf32>
    %38 = vector.broadcast %37 : vector<1x13xf32> to vector<8x13xf32>
    %39 = arith.addf %36, %38 : vector<8x13xf32>
    %cst_26 = arith.constant 0.000000e+00 : f32
    %40 = vector.broadcast %cst_26 : f32 to vector<8x12xf32>
    %41 = arith.cmpf oeq, %0, %40 : vector<8x12xf32>
    %42 = vector.extract_strided_slice %39 {offsets = [0, 0], sizes = [8, 12], strides = [1, 1]} : vector<8x13xf32> to vector<8x12xf32>
    %cst_27 = arith.constant -5.000000e+00 : f32
    %43 = vector.broadcast %cst_27 : f32 to vector<8x12xf32>
    %44 = arith.select %41, %43, %42 : vector<8x12xi1>, vector<8x12xf32>
    %cst_28 = arith.constant 2.000000e-01 : f32
    %45 = vector.broadcast %cst_28 : f32 to vector<8x1xf32>
    %46 = tpu.concatenate %44, %45 in 1 : vector<8x12xf32>, vector<8x1xf32> -> vector<8x13xf32>
    %c0_29 = arith.constant 0 : index
    %c0_30 = arith.constant 0 : index
    %47 = vector.load %arg10[%c0_29, %c0_30] : memref<8x13xf32, #tpu.memory_space<vmem>>, vector<8x13xf32>
    tpu.vector_store %arg10[%c0_29, %c0_30], %46 {strides = array<i32>} : memref<8x13xf32, #tpu.memory_space<vmem>>, vector<8x13xf32>,
    return
  }
  func.func @transform_0(%arg0: i32) -> (i32, i32) {
    %c0_i32 = arith.constant 0 : i32
    %c0_i32_0 = arith.constant 0 : i32
    return %arg0, %c0_i32 : i32, i32
  }
  func.func @transform_1(%arg0: i32) -> (i32, i32) {
    %c0_i32 = arith.constant 0 : i32
    %c0_i32_0 = arith.constant 0 : i32
    %c0_i32_1 = arith.constant 0 : i32
    return %c0_i32, %c0_i32_0 : i32, i32
  }
  func.func @transform_2(%arg0: i32) -> (i32, i32) {
    %c0_i32 = arith.constant 0 : i32
    %c0_i32_0 = arith.constant 0 : i32
    %c0_i32_1 = arith.constant 0 : i32
    return %c0_i32, %c0_i32_0 : i32, i32
  }
  func.func @transform_3(%arg0: i32) -> (i32, i32) {
    %c0_i32 = arith.constant 0 : i32
    %c0_i32_0 = arith.constant 0 : i32
    %c0_i32_1 = arith.constant 0 : i32
    return %c0_i32, %c0_i32_0 : i32, i32
  }
  func.func @transform_4(%arg0: i32) -> (i32, i32) {
    %c0_i32 = arith.constant 0 : i32
    %c0_i32_0 = arith.constant 0 : i32
    %c0_i32_1 = arith.constant 0 : i32
    return %c0_i32, %c0_i32_0 : i32, i32
  }
  func.func @transform_5(%arg0: i32) -> (i32, i32) {
    %c0_i32 = arith.constant 0 : i32
    %c0_i32_0 = arith.constant 0 : i32
    %c0_i32_1 = arith.constant 0 : i32
    return %c0_i32, %c0_i32_0 : i32, i32
  }
  func.func @transform_6(%arg0: i32) -> (i32, i32) {
    %c0_i32 = arith.constant 0 : i32
    %c0_i32_0 = arith.constant 0 : i32
    %c0_i32_1 = arith.constant 0 : i32
    return %c0_i32, %c0_i32_0 : i32, i32
  }
  func.func @transform_7(%arg0: i32) -> (i32, i32) {
    %c0_i32 = arith.constant 0 : i32
    %c0_i32_0 = arith.constant 0 : i32
    %c0_i32_1 = arith.constant 0 : i32
    return %c0_i32, %c0_i32_0 : i32, i32
  }
  func.func @transform_8(%arg0: i32) -> (i32, i32) {
    %c0_i32 = arith.constant 0 : i32
    %c0_i32_0 = arith.constant 0 : i32
    %c0_i32_1 = arith.constant 0 : i32
    return %c0_i32, %c0_i32_0 : i32, i32
  }
  func.func @transform_9(%arg0: i32) -> (i32, i32) {
    %c0_i32 = arith.constant 0 : i32
    %c0_i32_0 = arith.constant 0 : i32
    return %arg0, %c0_i32 : i32, i32
  }
}

</mosaic_0001>

<bundles_post_ra>
// kernel: tpu_custom_call.1
= control target key start
LH: loop header
LB: loop body
LE: loop exit
PB: predicated region body
PF: predicated region fallthrough
CT: control target
= control target key end

     0   :  { %14 = vsyncpa [#allocation3], 0  ;;  %s3597_s0 = inlined_call_operand.vmem [shape: f32[8,12], index: 0, kind: input, shape index: {}]   ;;  %s3598_s1 = inlined_call_operand.vmem [shape: bf16[12,512], index: 1, kind: input, shape index: {}]   ;;  %s3599_s2 = inlined_call_operand.vmem [shape: f32[1,512], index: 2, kind: input, shape index: {}]   ;;  %s3600_s3 = inlined_call_operand.hbm [shape: bf16[512,512], index: 3, kind: input, shape index: {}]   ;;  %s3601_s4 = inlined_call_operand.vmem [shape: f32[1,512], index: 4, kind: input, shape index: {}]   ;;  %s3602_s5 = inlined_call_operand.hbm [shape: bf16[512,512], index: 5, kind: input, shape index: {}]   ;;  %s3603_s6 = inlined_call_operand.vmem [shape: f32[1,512], index: 6, kind: input, shape index: {}]   ;;  %s3604_s7 = inlined_call_operand.vmem [shape: bf16[512,13], index: 7, kind: input, shape index: {}]   ;;  %s3605_s8 = inlined_call_operand.vmem [shape: f32[1,13], index: 8, kind: input, shape index: {}]   ;;  %s3606_s9 = inlined_call_operand.hbm [shape: f32[8,13], index: 9, kind: output, shape index: {}]  }
   0x1   :  { %15 = vsyncpa [#allocation6], 0 }
   0x2   :  { %16 = vsyncpa [#allocation4], 0  ;;  %s3361_s30 = smov [#allocation2]  }
   0x3   :  { %s28_s10 = sshll.u32 %s3361_s30, 4  ;;  %s29_s10 = int_to_ptr.vmem [resolvable:$true] %s28_s10 }
   0x4   :  { %s3303_s11 = scalar_lea.vmem %s29_s10, 16384  ;;  %p3308_p1 = scmp.lt.s32.totalorder %s29_s10, %s29_s10 }
   0x5   :  { %p3304_p0 = scmp.ne.s32.totalorder %s29_s10, %s3303_s11  ;;  %p3309_p2 = scmp.lt.s32.totalorder %s3303_s11, %s3303_s11 }
   0x7   :  { %p3310_p3 = por %p3309_p2, %p3308_p1 }
   0x9   :  { %p3311_p4 = pnand %p3310_p3, %p3304_p0 }
   0xb   :  { %3314 = shalt.err (!%p3311_p4)
}
   0xc   :  { %s3362_s12 = smov 256   ;;  %s3363_s13 = smov 16  }
   0xd   :  { %34 = dma.hbm_to_vmem [thread:$0]  %s3600_s3, 16384, %s29_s10, [#allocation3], %s3362_s12, %s3362_s12, %s3363_s13  }
   0xe   :  { %s3364_s16 = smov [#allocation5]  }
   0xf   :  { %s42_s17 = sshll.u32 %s3364_s16, 4  ;;  %s43_s17 = int_to_ptr.vmem [resolvable:$true] %s42_s17 }
  0x10   :  { %s3323_s18 = scalar_lea.vmem %s43_s17, 16384  ;;  %p3328_p6 = scmp.lt.s32.totalorder %s43_s17, %s43_s17 }
  0x11   :  { %p3324_p5 = scmp.ne.s32.totalorder %s43_s17, %s3323_s18  ;;  %p3329_p7 = scmp.lt.s32.totalorder %s3323_s18, %s3323_s18 }
  0x13   :  { %p3330_p8 = por %p3329_p7, %p3328_p6 }
  0x15   :  { %p3331_p9 = pnand %p3330_p8, %p3324_p5 }
  0x17   :  { %3334 = shalt.err (!%p3331_p9)
}
  0x18   :  { %48 = dma.hbm_to_vmem [thread:$0]  %s3602_s5, 16384, %s43_s17, [#allocation6], %s3362_s12, %s3362_s12, %s3363_s13  }
  0x19   :  { %3355 = dma.done.wait [#allocation3], 16384  }
  0x1a   :  { %3356 = vsyncadd [#allocation3], 4294950912 }
  0x1b   :  { %3357 = dma.done.wait [#allocation6], 16384  }
  0x1c   :  { %3358 = vsyncadd [#allocation6], 4294950912  ;;  %v3365_v0 = vmov 0   ;;  %vm110_vm0 = vcmask 1045504   ;;  %v62_v5 = vld [vmem:[%s3597_s0] sm:$0xff]  ;;  %vm106_vm1 = vcmask 97280  }
  0x1d   :  { %155 = vmatprep.mubr.bf16.mxu0 %v3365_v0  ;;  %196 = vmatprep.mubr.bf16.mxu1 %v3365_v0  ;;  %v2872_v1 = vld [vmem:[%s3598_s1 + $0x4] ss:$16 sps:$4 sm:$0x3f]   ;;  %v2874_v2 = vld [vmem:[%s3598_s1 + $0xc] ss:$16 sps:$4 sm:$0x3f]   ;;  %v63_v8 = vpack.c.bf16 %v62_v5, %v62_v5 }
  0x1e   :  { %2529 = vmatprep.subr.msk.bf16.mxu0 %vm110_vm0, %v2872_v1  ;;  %v2876_v3 = vld [vmem:[%s3598_s1] ss:$16 sps:$4 sm:$0x3f]   ;;  %v2877_v4 = vld [vmem:[%s3598_s1 + $0x8] ss:$16 sps:$4 sm:$0x3f]   ;;  %2531 = vmatprep.subr.msk.bf16.mxu1 %vm110_vm0, %v2874_v2 }
  0x1f   :  { %v112_v6 = vsel %vm110_vm0, %v2876_v3, 0  ;;  %v118_v7 = vsel %vm110_vm0, %v2877_v4, 0  ;;  %v2878_v9 = vld [vmem:[#allocation2 + $0xe0] ss:$16 sps:$4 sm:$0xff]   ;;  %v2880_v10 = vld [vmem:[#allocation2 + $0xe4] ss:$16 sps:$4 sm:$0xff]  }
  0x20   :  { %138 = vmatpush1.bf16.msra.mxu0 %v112_v6  ;;  %179 = vmatpush1.bf16.msra.mxu1 %v118_v7  ;;  %v2881_v11 = vld [vmem:[#allocation2 + $0x2e0] ss:$16 sps:$4 sm:$0xff]   ;;  %v2883_v12 = vld [vmem:[#allocation2 + $0x2e4] ss:$16 sps:$4 sm:$0xff]   ;;  %s3366_s24 = smov [#allocation7]   ;;  %vm2507_vm15 = vcmask 105472  }
  0x21   :  { %1011 = vmatprep.subr.bf16.mxu0 %v2880_v10  ;;  %v2886_v13 = vld [vmem:[#allocation2 + $0xc4] ss:$16 sps:$4 sm:$0xff]   ;;  %v2884_v14 = vld [vmem:[#allocation2 + $0xc0] ss:$16 sps:$4 sm:$0xff]   ;;  %1052 = vmatprep.subr.bf16.mxu1 %v2883_v12  ;;  %v2979_v10 = vld [vmem:[#allocation2 + $0x2ec] ss:$16 sps:$4 sm:$0xff]  }
  0x22   :  { %v2889_v15 = vld [vmem:[#allocation2 + $0x2c4] ss:$16 sps:$4 sm:$0xff]   ;;  %v2887_v16 = vld [vmem:[#allocation2 + $0x2c0] ss:$16 sps:$4 sm:$0xff]   ;;  %s2515_s25 = sshll.u32 %s3366_s24, 4  ;;  %s2516_s25 = int_to_ptr.vmem [resolvable:$true] %s2515_s25 }
  0x23   :  { %2530 = vmatmul.mubr.msk.bf16.vlgmr.msra.gmra.mxu0 %vm106_vm1, %v63_v8  ;;  %2532 = vmatmul.mubr.msk.bf16.vlgmr.msra.gmra.mxu1 %vm106_vm1, %v63_v8  ;;  %v2892_v17 = vld [vmem:[#allocation2 + $0xa4] ss:$16 sps:$4 sm:$0xff]   ;;  %v2890_v19 = vld [vmem:[#allocation2 + $0xa0] ss:$16 sps:$4 sm:$0xff]   ;;  %p3340_p11 = scmp.lt.s32.totalorder %s2516_s25, %s2516_s25 }
  0x24   :  { %1012 = vmatpush1.bf16.msra.mxu0 %v2878_v9  ;;  %1053 = vmatpush1.bf16.msra.mxu1 %v2881_v11  ;;  %v2895_v18 = vld [vmem:[#allocation2 + $0x2a4] ss:$16 sps:$4 sm:$0xff]   ;;  %v2893_v20 = vld [vmem:[#allocation2 + $0x2a0] ss:$16 sps:$4 sm:$0xff]   ;;  %v2976_v9 = vld [vmem:[#allocation2 + $0xec] ss:$16 sps:$4 sm:$0xff]   ;;  %v70_v11 = vlaneseq }
  0x25   :  { %1013 = vmatprep.subr.bf16.mxu0 %v2886_v13  ;;  %1054 = vmatprep.subr.bf16.mxu1 %v2889_v15  ;;  %v2898_v21 = vld [vmem:[#allocation2 + $0x84] ss:$16 sps:$4 sm:$0xff]   ;;  %v2896_v23 = vld [vmem:[#allocation2 + $0x80] ss:$16 sps:$4 sm:$0xff]  }
  0x26   :  { %v2901_v22 = vld [vmem:[#allocation2 + $0x284] ss:$16 sps:$4 sm:$0xff]   ;;  %v2899_v24 = vld [vmem:[#allocation2 + $0x280] ss:$16 sps:$4 sm:$0xff]   ;;  %v71_v12 = vshrl.u32 %v70_v11, 7 }
  0x27   :  { %v2904_v25 = vld [vmem:[#allocation2 + $0x64] ss:$16 sps:$4 sm:$0xff]   ;;  %v2902_v27 = vld [vmem:[#allocation2 + $0x60] ss:$16 sps:$4 sm:$0xff]   ;;  %v3019_v11 = vld [vmem:[#allocation2 + $0x208] ss:$16 sps:$4 sm:$0xff]  }
  0x28   :  { %1014 = vmatpush1.bf16.msra.mxu0 %v2884_v14  ;;  %1055 = vmatpush1.bf16.msra.mxu1 %v2887_v16  ;;  %v2907_v26 = vld [vmem:[#allocation2 + $0x264] ss:$16 sps:$4 sm:$0xff]   ;;  %v2905_v28 = vld [vmem:[#allocation2 + $0x260] ss:$16 sps:$4 sm:$0xff]   ;;  %v3440_v13 = vsub.s32 0, %v71_v12  ;;  %v3442_v14 = vsub.s32 2, %v71_v12 }
  0x29   :  { %1015 = vmatprep.subr.bf16.mxu0 %v2892_v17  ;;  %1056 = vmatprep.subr.bf16.mxu1 %v2895_v18  ;;  %v2910_v29 = vld [vmem:[#allocation2 + $0x44] ss:$16 sps:$4 sm:$0xff]   ;;  %v2908_v31 = vld [vmem:[#allocation2 + $0x40] ss:$16 sps:$4 sm:$0xff]   ;;  %v3447_v16 = vsub.s32 1, %v71_v12  ;;  %v3449_v17 = vsub.s32 3, %v71_v12 }
  0x2a   :  { %v2913_v30 = vld [vmem:[#allocation2 + $0x244] ss:$16 sps:$4 sm:$0xff]   ;;  %v2911_v32 = vld [vmem:[#allocation2 + $0x240] ss:$16 sps:$4 sm:$0xff]   ;;  %v3024_v12 = vld [vmem:[#allocation2 + $0x1ec] ss:$16 sps:$4 sm:$0xff]  }
  0x2b   :  { %v2916_v33 = vld [vmem:[#allocation2 + $0x24] ss:$16 sps:$4 sm:$0xff]   ;;  %v2914_v35 = vld [vmem:[#allocation2 + $0x20] ss:$16 sps:$4 sm:$0xff]  }
  0x2c   :  { %1016 = vmatpush1.bf16.msra.mxu0 %v2890_v19  ;;  %1057 = vmatpush1.bf16.msra.mxu1 %v2893_v20  ;;  %v2919_v34 = vld [vmem:[#allocation2 + $0x224] ss:$16 sps:$4 sm:$0xff]   ;;  %v2917_v36 = vld [vmem:[#allocation2 + $0x220] ss:$16 sps:$4 sm:$0xff]  }
  0x2d   :  { %1017 = vmatprep.subr.bf16.mxu0 %v2898_v21  ;;  %1058 = vmatprep.subr.bf16.mxu1 %v2901_v22  ;;  %v2922_v37 = vld [vmem:[#allocation2 + $0x4] ss:$16 sps:$4 sm:$0xff]   ;;  %v2920_v39 = vld [vmem:[#allocation2] ss:$16 sps:$4 sm:$0xff]  }
  0x2e   :  { %v2925_v38 = vld [vmem:[#allocation2 + $0x204] ss:$16 sps:$4 sm:$0xff]   ;;  %v2923_v40 = vld [vmem:[#allocation2 + $0x200] ss:$16 sps:$4 sm:$0xff]  }
  0x2f   :  { %v2928_v41 = vld [vmem:[#allocation2 + $0x1e4] ss:$16 sps:$4 sm:$0xff]   ;;  %v2926_v43 = vld [vmem:[#allocation2 + $0x1e0] ss:$16 sps:$4 sm:$0xff]  }
  0x30   :  { %1018 = vmatpush1.bf16.msra.mxu0 %v2896_v23  ;;  %1059 = vmatpush1.bf16.msra.mxu1 %v2899_v24  ;;  %v2931_v42 = vld [vmem:[#allocation2 + $0x3e4] ss:$16 sps:$4 sm:$0xff]   ;;  %v2929_v44 = vld [vmem:[#allocation2 + $0x3e0] ss:$16 sps:$4 sm:$0xff]  }
  0x31   :  { %1019 = vmatprep.subr.bf16.mxu0 %v2904_v25  ;;  %1060 = vmatprep.subr.bf16.mxu1 %v2907_v26  ;;  %v2934_v45 = vld [vmem:[#allocation2 + $0x1c4] ss:$16 sps:$4 sm:$0xff]   ;;  %v2932_v46 = vld [vmem:[#allocation2 + $0x1c0] ss:$16 sps:$4 sm:$0xff]  }
  0x32   :  { %v2937_v47 = vld [vmem:[#allocation2 + $0x3c4] ss:$16 sps:$4 sm:$0xff]   ;;  %v2935_v48 = vld [vmem:[#allocation2 + $0x3c0] ss:$16 sps:$4 sm:$0xff]  }
  0x33   :  { %v2940_v49 = vld [vmem:[#allocation2 + $0x1a4] ss:$16 sps:$4 sm:$0xff]   ;;  %v2938_v51 = vld [vmem:[#allocation2 + $0x1a0] ss:$16 sps:$4 sm:$0xff]  }
  0x34   :  { %1020 = vmatpush1.bf16.msra.mxu0 %v2902_v27  ;;  %1061 = vmatpush1.bf16.msra.mxu1 %v2905_v28  ;;  %v2943_v50 = vld [vmem:[#allocation2 + $0x3a4] ss:$16 sps:$4 sm:$0xff]   ;;  %v2941_v52 = vld [vmem:[#allocation2 + $0x3a0] ss:$16 sps:$4 sm:$0xff]  }
  0x35   :  { %1021 = vmatprep.subr.bf16.mxu0 %v2910_v29  ;;  %1062 = vmatprep.subr.bf16.mxu1 %v2913_v30  ;;  %v2946_v53 = vld [vmem:[#allocation2 + $0x184] ss:$16 sps:$4 sm:$0xff]   ;;  %v2944_v55 = vld [vmem:[#allocation2 + $0x180] ss:$16 sps:$4 sm:$0xff]  }
  0x36   :  { %v2949_v54 = vld [vmem:[#allocation2 + $0x384] ss:$16 sps:$4 sm:$0xff]   ;;  %v2947_v56 = vld [vmem:[#allocation2 + $0x380] ss:$16 sps:$4 sm:$0xff]  }
  0x37   :  { %v2952_v57 = vld [vmem:[#allocation2 + $0x164] ss:$16 sps:$4 sm:$0xff]   ;;  %v2950_v59 = vld [vmem:[#allocation2 + $0x160] ss:$16 sps:$4 sm:$0xff]  }
  0x38   :  { %1022 = vmatpush1.bf16.msra.mxu0 %v2908_v31  ;;  %1063 = vmatpush1.bf16.msra.mxu1 %v2911_v32  ;;  %v2955_v58 = vld [vmem:[#allocation2 + $0x364] ss:$16 sps:$4 sm:$0xff]   ;;  %v2953_v60 = vld [vmem:[#allocation2 + $0x360] ss:$16 sps:$4 sm:$0xff]  }
  0x39   :  { %1023 = vmatprep.subr.bf16.mxu0 %v2916_v33  ;;  %1064 = vmatprep.subr.bf16.mxu1 %v2919_v34  ;;  %v2958_v61 = vld [vmem:[#allocation2 + $0x144] ss:$16 sps:$4 sm:$0xff]   ;;  %v2956_v63 = vld [vmem:[#allocation2 + $0x140] ss:$16 sps:$4 sm:$0xff]  }
  0x3a   :  { %v2961_v62 = vld [vmem:[#allocation2 + $0x344] ss:$16 sps:$4 sm:$0xff]   ;;  %v2959_v0 = vld [vmem:[#allocation2 + $0x340] ss:$16 sps:$4 sm:$0xff]  }
  0x3b   :  { %v2964_v1 = vld [vmem:[#allocation2 + $0x124] ss:$16 sps:$4 sm:$0xff]   ;;  %v2962_v3 = vld [vmem:[#allocation2 + $0x120] ss:$16 sps:$4 sm:$0xff]  }
  0x3c   :  { %1024 = vmatpush1.bf16.msra.mxu0 %v2914_v35  ;;  %1065 = vmatpush1.bf16.msra.mxu1 %v2917_v36  ;;  %v2967_v2 = vld [vmem:[#allocation2 + $0x324] ss:$16 sps:$4 sm:$0xff]   ;;  %v2965_v4 = vld [vmem:[#allocation2 + $0x320] ss:$16 sps:$4 sm:$0xff]  }
  0x3d   :  { %1025 = vmatprep.subr.bf16.mxu0 %v2922_v37  ;;  %1066 = vmatprep.subr.bf16.mxu1 %v2925_v38  ;;  %v2970_v5 = vld [vmem:[#allocation2 + $0x104] ss:$16 sps:$4 sm:$0xff]   ;;  %v2968_v7 = vld [vmem:[#allocation2 + $0x100] ss:$16 sps:$4 sm:$0xff]  }
  0x3e   :  { %v2973_v6 = vld [vmem:[#allocation2 + $0x304] ss:$16 sps:$4 sm:$0xff]   ;;  %v2971_v8 = vld [vmem:[#allocation2 + $0x300] ss:$16 sps:$4 sm:$0xff]  }
  0x3f   :  { %v68_v15 = vld [vmem:[%s3599_s2] sm:$0xf] }
  0x40   :  { %1026 = vmatpush1.bf16.msra.mxu0 %v2920_v39  ;;  %1067 = vmatpush1.bf16.msra.mxu1 %v2923_v40  ;;  %v73_v18 = vrot.slane %v68_v15, %v3440_v13  ;;  %v81_v19 = vrot.slane %v68_v15, %v3442_v14  ;;  %v77_v22 = vrot.slane %v68_v15, %v3447_v16 }
  0x41   :  { %1027 = vmatprep.subr.bf16.mxu0 %v2928_v41  ;;  %1068 = vmatprep.subr.bf16.mxu1 %v2931_v42  ;;  %v85_v23 = vrot.slane %v68_v15, %v3449_v17  ;;  %v3027_v15 = vld [vmem:[#allocation2 + $0x3ec] ss:$16 sps:$4 sm:$0xff]  }
  0x44   :  { %1028 = vmatpush2.bf16.msra.mxu0 %v2926_v43  ;;  %1069 = vmatpush2.bf16.msra.mxu1 %v2929_v44  ;;  %v2974_v43 = vld [vmem:[#allocation2 + $0xe8] ss:$16 sps:$4 sm:$0xff]  }
  0x45   :  { %1029 = vmatprep.subr.bf16.mxu0 %v2934_v45  ;;  %1070 = vmatprep.subr.bf16.mxu1 %v2937_v47 }
  0x48   :  { %1030 = vmatpush2.bf16.msra.mxu0 %v2932_v46  ;;  %1071 = vmatpush2.bf16.msra.mxu1 %v2935_v48  ;;  %v2977_v46 = vld [vmem:[#allocation2 + $0x2e8] ss:$16 sps:$4 sm:$0xff]   ;;  %v2982_v48 = vld [vmem:[#allocation2 + $0xcc] ss:$16 sps:$4 sm:$0xff]  }
  0x49   :  { %1031 = vmatprep.subr.bf16.mxu0 %v2940_v49  ;;  %1072 = vmatprep.subr.bf16.mxu1 %v2943_v50  ;;  %v2985_v49 = vld [vmem:[#allocation2 + $0x2cc] ss:$16 sps:$4 sm:$0xff]   ;;  %v2980_v50 = vld [vmem:[#allocation2 + $0xc8] ss:$16 sps:$4 sm:$0xff]  }
  0x4c   :  { %1032 = vmatpush2.bf16.msra.mxu0 %v2938_v51  ;;  %1073 = vmatpush2.bf16.msra.mxu1 %v2941_v52  ;;  %v2983_v51 = vld [vmem:[#allocation2 + $0x2c8] ss:$16 sps:$4 sm:$0xff]   ;;  %v2988_v52 = vld [vmem:[#allocation2 + $0xac] ss:$16 sps:$4 sm:$0xff]  }
  0x4d   :  { %1033 = vmatprep.subr.bf16.mxu0 %v2946_v53  ;;  %1074 = vmatprep.subr.bf16.mxu1 %v2949_v54  ;;  %v2991_v53 = vld [vmem:[#allocation2 + $0x2ac] ss:$16 sps:$4 sm:$0xff]   ;;  %v2986_v54 = vld [vmem:[#allocation2 + $0xa8] ss:$16 sps:$4 sm:$0xff]  }
  0x50   :  { %1034 = vmatpush2.bf16.msra.mxu0 %v2944_v55  ;;  %1075 = vmatpush2.bf16.msra.mxu1 %v2947_v56  ;;  %v2989_v55 = vld [vmem:[#allocation2 + $0x2a8] ss:$16 sps:$4 sm:$0xff]   ;;  %v2994_v56 = vld [vmem:[#allocation2 + $0x8c] ss:$16 sps:$4 sm:$0xff]  }
  0x51   :  { %1035 = vmatprep.subr.bf16.mxu0 %v2952_v57  ;;  %1076 = vmatprep.subr.bf16.mxu1 %v2955_v58  ;;  %v2997_v57 = vld [vmem:[#allocation2 + $0x28c] ss:$16 sps:$4 sm:$0xff]   ;;  %v2992_v58 = vld [vmem:[#allocation2 + $0x88] ss:$16 sps:$4 sm:$0xff]  }
  0x54   :  { %1036 = vmatpush2.bf16.msra.mxu0 %v2950_v59  ;;  %1077 = vmatpush2.bf16.msra.mxu1 %v2953_v60  ;;  %v2995_v59 = vld [vmem:[#allocation2 + $0x288] ss:$16 sps:$4 sm:$0xff]   ;;  %v3000_v60 = vld [vmem:[#allocation2 + $0x6c] ss:$16 sps:$4 sm:$0xff]  }
  0x55   :  { %1037 = vmatprep.subr.bf16.mxu0 %v2958_v61  ;;  %1078 = vmatprep.subr.bf16.mxu1 %v2961_v62  ;;  %v3003_v61 = vld [vmem:[#allocation2 + $0x26c] ss:$16 sps:$4 sm:$0xff]   ;;  %v2998_v62 = vld [vmem:[#allocation2 + $0x68] ss:$16 sps:$4 sm:$0xff]  }
  0x58   :  { %1038 = vmatpush2.bf16.msra.mxu0 %v2956_v63  ;;  %1079 = vmatpush2.bf16.msra.mxu1 %v2959_v0  ;;  %v3001_v63 = vld [vmem:[#allocation2 + $0x268] ss:$16 sps:$4 sm:$0xff]   ;;  %v3006_v0 = vld [vmem:[#allocation2 + $0x4c] ss:$16 sps:$4 sm:$0xff]  }
  0x59   :  { %1039 = vmatprep.subr.bf16.mxu0 %v2964_v1  ;;  %1080 = vmatprep.subr.bf16.mxu1 %v2967_v2  ;;  %v3009_v1 = vld [vmem:[#allocation2 + $0x24c] ss:$16 sps:$4 sm:$0xff]   ;;  %v3004_v2 = vld [vmem:[#allocation2 + $0x48] ss:$16 sps:$4 sm:$0xff]  }
  0x5c   :  { %1040 = vmatpush2.bf16.msra.mxu0 %v2962_v3  ;;  %1081 = vmatpush2.bf16.msra.mxu1 %v2965_v4  ;;  %v3007_v3 = vld [vmem:[#allocation2 + $0x248] ss:$16 sps:$4 sm:$0xff]   ;;  %v3012_v4 = vld [vmem:[#allocation2 + $0x2c] ss:$16 sps:$4 sm:$0xff]  }
  0x5d   :  { %1041 = vmatprep.subr.bf16.mxu0 %v2970_v5  ;;  %1082 = vmatprep.subr.bf16.mxu1 %v2973_v6  ;;  %v3015_v5 = vld [vmem:[#allocation2 + $0x22c] ss:$16 sps:$4 sm:$0xff]   ;;  %v3010_v6 = vld [vmem:[#allocation2 + $0x28] ss:$16 sps:$4 sm:$0xff]  }
  0x60   :  { %1042 = vmatpush2.bf16.msra.mxu0 %v2968_v7  ;;  %1083 = vmatpush2.bf16.msra.mxu1 %v2971_v8  ;;  %v3013_v7 = vld [vmem:[#allocation2 + $0x228] ss:$16 sps:$4 sm:$0xff]   ;;  %v3018_v8 = vld [vmem:[#allocation2 + $0xc] ss:$16 sps:$4 sm:$0xff]  }
  0x61   :  { %1093 = vmatprep.subr.bf16.mxu0 %v2976_v9  ;;  %1134 = vmatprep.subr.bf16.mxu1 %v2979_v10  ;;  %v3021_v9 = vld [vmem:[#allocation2 + $0x20c] ss:$16 sps:$4 sm:$0xff]   ;;  %v3016_v10 = vld [vmem:[#allocation2 + $0x8] ss:$16 sps:$4 sm:$0xff]  }
  0xe3   :  { %v157_v20 = vpop.f32.mrf.mxu0  ;;  %v198_v21 = vpop.f32.mrf.mxu1 }
  0xe4   :  { %v158_v24 = vadd.f32 %v157_v20, %v73_v18  ;;  %v199_v25 = vadd.f32 %v198_v21, %v81_v19  ;;  %v3022_v18 = vld [vmem:[#allocation2 + $0x1e8] ss:$16 sps:$4 sm:$0xff]   ;;  %v3030_v20 = vld [vmem:[#allocation2 + $0x1cc] ss:$16 sps:$4 sm:$0xff]  }
  0xe5   :  { %v159_v26 = vpop.f32.mrf.mxu0  ;;  %v200_v27 = vpop.f32.mrf.mxu1  ;;  %v3025_v19 = vld [vmem:[#allocation2 + $0x3e8] ss:$16 sps:$4 sm:$0xff]   ;;  %v3033_v21 = vld [vmem:[#allocation2 + $0x3cc] ss:$16 sps:$4 sm:$0xff]  }
  0xe6   :  { %v209_v28 = vmul.f32 0.01, %v158_v24  ;;  %vm205_vm2 = vcmp.gt.f32.partialorder %v158_v24, 0.0  ;;  %v211_v29 = vmul.f32 0.01, %v199_v25  ;;  %v160_v30 = vadd.f32 %v159_v26, %v77_v22 }
  0xe7   :  { %v201_v31 = vadd.f32 %v200_v27, %v85_v23  ;;  %v161_v32 = vpop.f32.mrf.mxu0  ;;  %v202_v33 = vpop.f32.mrf.mxu1  ;;  %vm207_vm3 = vcmp.gt.f32.partialorder %v199_v25, 0.0  ;;  %v3028_v22 = vld [vmem:[#allocation2 + $0x1c8] ss:$16 sps:$4 sm:$0xff]  }
  0xe8   :  { %vm206_vm4 = vcmp.gt.f32.partialorder %v160_v30, 0.0  ;;  %v210_v34 = vmul.f32 0.01, %v160_v30  ;;  %v213_v37 = vsel %vm205_vm2, %v158_v24, %v209_v28  ;;  %v215_v39 = vsel %vm207_vm3, %v199_v25, %v211_v29  ;;  %v3031_v23 = vld [vmem:[#allocation2 + $0x3c8] ss:$16 sps:$4 sm:$0xff]  }
  0xe9   :  { %v162_v35 = vpop.f32.mrf.mxu0  ;;  %v203_v36 = vpop.f32.mrf.mxu1  ;;  %vm208_vm5 = vcmp.gt.f32.partialorder %v201_v31, 0.0  ;;  %v212_v38 = vmul.f32 0.01, %v201_v31  ;;  %v3455_v44 = vpack.c.bf16 %v213_v37, %v213_v37  ;;  %v3457_v47 = vpack.c.bf16 %v215_v39, %v215_v39  ;;  %v3036_v24 = vld [vmem:[#allocation2 + $0x1ac] ss:$16 sps:$4 sm:$0xff]  }
  0xea   :  { %v214_v40 = vsel %vm206_vm4, %v160_v30, %v210_v34  ;;  %v3039_v25 = vld [vmem:[#allocation2 + $0x3ac] ss:$16 sps:$4 sm:$0xff]   ;;  %v3034_v26 = vld [vmem:[#allocation2 + $0x1a8] ss:$16 sps:$4 sm:$0xff]  }
  0xeb   :  { %v218_v41 = vpack.c.bf16 %v214_v40, %v214_v40  ;;  %v216_v42 = vsel %vm208_vm5, %v201_v31, %v212_v38  ;;  %v3037_v27 = vld [vmem:[#allocation2 + $0x3a8] ss:$16 sps:$4 sm:$0xff]   ;;  %v3042_v28 = vld [vmem:[#allocation2 + $0x18c] ss:$16 sps:$4 sm:$0xff]  }
  0xec   :  { %v220_v45 = vpack.c.bf16 %v216_v42, %v216_v42  ;;  %v3045_v29 = vld [vmem:[#allocation2 + $0x38c] ss:$16 sps:$4 sm:$0xff]   ;;  %v3040_v30 = vld [vmem:[#allocation2 + $0x188] ss:$16 sps:$4 sm:$0xff]  }
  0xed   :  { %1043 = vmatprep.mubr.bf16.mxu0 %v218_v41  ;;  %v3043_v31 = vld [vmem:[#allocation2 + $0x388] ss:$16 sps:$4 sm:$0xff]   ;;  %v3048_v32 = vld [vmem:[#allocation2 + $0x16c] ss:$16 sps:$4 sm:$0xff]  }
  0xee   :  { %1084 = vmatprep.mubr.bf16.mxu1 %v220_v45  ;;  %1044 = vmatmul.mubr.bf16.vlgmr.msra.gmra.mxu0 %v3455_v44  ;;  %v3051_v33 = vld [vmem:[#allocation2 + $0x36c] ss:$16 sps:$4 sm:$0xff]   ;;  %v3046_v34 = vld [vmem:[#allocation2 + $0x168] ss:$16 sps:$4 sm:$0xff]  }
  0xef   :  { %1085 = vmatmul.mubr.bf16.vlgmr.msra.gmra.mxu1 %v3457_v47  ;;  %1094 = vmatpush1.bf16.msra.mxu0 %v2974_v43  ;;  %v3049_v35 = vld [vmem:[#allocation2 + $0x368] ss:$16 sps:$4 sm:$0xff]   ;;  %v3054_v36 = vld [vmem:[#allocation2 + $0x14c] ss:$16 sps:$4 sm:$0xff]  }
  0xf0   :  { %1135 = vmatpush1.bf16.msra.mxu1 %v2977_v46  ;;  %1125 = vmatprep.mubr.bf16.mxu0 %v218_v41  ;;  %v3057_v37 = vld [vmem:[#allocation2 + $0x34c] ss:$16 sps:$4 sm:$0xff]   ;;  %v3052_v38 = vld [vmem:[#allocation2 + $0x148] ss:$16 sps:$4 sm:$0xff]  }
  0xf1   :  { %1166 = vmatprep.mubr.bf16.mxu1 %v220_v45  ;;  %1095 = vmatprep.subr.bf16.mxu0 %v2982_v48  ;;  %v3055_v39 = vld [vmem:[#allocation2 + $0x348] ss:$16 sps:$4 sm:$0xff]   ;;  %v3060_v40 = vld [vmem:[#allocation2 + $0x12c] ss:$16 sps:$4 sm:$0xff]  }
  0xf2   :  { %1136 = vmatprep.subr.bf16.mxu1 %v2985_v49  ;;  %v3063_v41 = vld [vmem:[#allocation2 + $0x32c] ss:$16 sps:$4 sm:$0xff]   ;;  %v3058_v42 = vld [vmem:[#allocation2 + $0x128] ss:$16 sps:$4 sm:$0xff]  }
  0xf3   :  { %1096 = vmatpush1.bf16.msra.mxu0 %v2980_v50  ;;  %v3061_v43 = vld [vmem:[#allocation2 + $0x328] ss:$16 sps:$4 sm:$0xff]   ;;  %v3066_v45 = vld [vmem:[#allocation2 + $0x10c] ss:$16 sps:$4 sm:$0xff]   ;;  %v3072_v50 = vld [vmem:[#allocation5 + $0xe4] ss:$16 sps:$4 sm:$0xff]  }
  0xf4   :  { %1137 = vmatpush1.bf16.msra.mxu1 %v2983_v51  ;;  %1097 = vmatprep.subr.bf16.mxu0 %v2988_v52  ;;  %v3069_v46 = vld [vmem:[#allocation2 + $0x30c] ss:$16 sps:$4 sm:$0xff]   ;;  %v3064_v48 = vld [vmem:[#allocation2 + $0x108] ss:$16 sps:$4 sm:$0xff]   ;;  %v3070_v51 = vld [vmem:[#allocation5 + $0xe0] ss:$16 sps:$4 sm:$0xff]  }
  0xf5   :  { %1138 = vmatprep.subr.bf16.mxu1 %v2991_v53  ;;  %v3067_v49 = vld [vmem:[#allocation2 + $0x308] ss:$16 sps:$4 sm:$0xff]   ;;  %v3075_v52 = vld [vmem:[#allocation5 + $0xc4] ss:$16 sps:$4 sm:$0xff]   ;;  %v3073_v53 = vld [vmem:[#allocation5 + $0xc0] ss:$16 sps:$4 sm:$0xff]  }
  0xf7   :  { %1098 = vmatpush1.bf16.msra.mxu0 %v2986_v54  ;;  %v3078_v54 = vld [vmem:[#allocation5 + $0xa4] ss:$16 sps:$4 sm:$0xff]  }
  0xf8   :  { %1139 = vmatpush1.bf16.msra.mxu1 %v2989_v55  ;;  %1099 = vmatprep.subr.bf16.mxu0 %v2994_v56  ;;  %v3076_v55 = vld [vmem:[#allocation5 + $0xa0] ss:$16 sps:$4 sm:$0xff]   ;;  %v3081_v56 = vld [vmem:[#allocation5 + $0x84] ss:$16 sps:$4 sm:$0xff]  }
  0xf9   :  { %1140 = vmatprep.subr.bf16.mxu1 %v2997_v57  ;;  %v3118_v57 = vld [vmem:[#allocation5 + $0x2e0] ss:$16 sps:$4 sm:$0xff]  }
  0xfb   :  { %1100 = vmatpush1.bf16.msra.mxu0 %v2992_v58  ;;  %v3079_v58 = vld [vmem:[#allocation5 + $0x80] ss:$16 sps:$4 sm:$0xff]  }
  0xfc   :  { %1141 = vmatpush1.bf16.msra.mxu1 %v2995_v59  ;;  %1101 = vmatprep.subr.bf16.mxu0 %v3000_v60  ;;  %v3120_v59 = vld [vmem:[#allocation5 + $0x2e4] ss:$16 sps:$4 sm:$0xff]  }
  0xfd   :  { %1142 = vmatprep.subr.bf16.mxu1 %v3003_v61  ;;  %v3084_v60 = vld [vmem:[#allocation5 + $0x64] ss:$16 sps:$4 sm:$0xff]   ;;  %v3124_v61 = vld [vmem:[#allocation5 + $0x2c0] ss:$16 sps:$4 sm:$0xff]  }
  0xff   :  { %1102 = vmatpush1.bf16.msra.mxu0 %v2998_v62  ;;  %v3126_v62 = vld [vmem:[#allocation5 + $0x2c4] ss:$16 sps:$4 sm:$0xff]  }
 0x100   :  { %1143 = vmatpush1.bf16.msra.mxu1 %v3001_v63  ;;  %1103 = vmatprep.subr.bf16.mxu0 %v3006_v0  ;;  %v3085_v63 = vld [vmem:[#allocation5 + $0x40] ss:$16 sps:$4 sm:$0xff]   ;;  %v3090_v0 = vld [vmem:[#allocation5 + $0x24] ss:$16 sps:$4 sm:$0xff]  }
 0x101   :  { %1144 = vmatprep.subr.bf16.mxu1 %v3009_v1  ;;  %v3130_v1 = vld [vmem:[#allocation5 + $0x2a0] ss:$16 sps:$4 sm:$0xff]  }
 0x103   :  { %1104 = vmatpush1.bf16.msra.mxu0 %v3004_v2  ;;  %v3132_v2 = vld [vmem:[#allocation5 + $0x2a4] ss:$16 sps:$4 sm:$0xff]  }
 0x104   :  { %1145 = vmatpush1.bf16.msra.mxu1 %v3007_v3  ;;  %1105 = vmatprep.subr.bf16.mxu0 %v3012_v4  ;;  %v3088_v3 = vld [vmem:[#allocation5 + $0x20] ss:$16 sps:$4 sm:$0xff]   ;;  %v3093_v4 = vld [vmem:[#allocation5 + $0x4] ss:$16 sps:$4 sm:$0xff]  }
 0x105   :  { %1146 = vmatprep.subr.bf16.mxu1 %v3015_v5  ;;  %v3136_v5 = vld [vmem:[#allocation5 + $0x280] ss:$16 sps:$4 sm:$0xff]  }
 0x107   :  { %1106 = vmatpush1.bf16.msra.mxu0 %v3010_v6  ;;  %v3138_v6 = vld [vmem:[#allocation5 + $0x284] ss:$16 sps:$4 sm:$0xff]  }
 0x108   :  { %1147 = vmatpush1.bf16.msra.mxu1 %v3013_v7  ;;  %1107 = vmatprep.subr.bf16.mxu0 %v3018_v8  ;;  %v3091_v7 = vld [vmem:[#allocation5] ss:$16 sps:$4 sm:$0xff]   ;;  %v3096_v8 = vld [vmem:[#allocation5 + $0x1e4] ss:$16 sps:$4 sm:$0xff]  }
 0x109   :  { %1148 = vmatprep.subr.bf16.mxu1 %v3021_v9  ;;  %v3142_v9 = vld [vmem:[#allocation5 + $0x260] ss:$16 sps:$4 sm:$0xff]  }
 0x10b   :  { %1108 = vmatpush1.bf16.msra.mxu0 %v3016_v10  ;;  %v3144_v10 = vld [vmem:[#allocation5 + $0x264] ss:$16 sps:$4 sm:$0xff]  }
 0x10c   :  { %1149 = vmatpush1.bf16.msra.mxu1 %v3019_v11  ;;  %1109 = vmatprep.subr.bf16.mxu0 %v3024_v12  ;;  %v3094_v11 = vld [vmem:[#allocation5 + $0x1e0] ss:$16 sps:$4 sm:$0xff]   ;;  %v3099_v12 = vld [vmem:[#allocation5 + $0x1c4] ss:$16 sps:$4 sm:$0xff]  }
 0x10d   :  { %1150 = vmatprep.subr.bf16.mxu1 %v3027_v15  ;;  %v3148_v15 = vld [vmem:[#allocation5 + $0x240] ss:$16 sps:$4 sm:$0xff]  }
 0x10f   :  { %1110 = vmatpush2.bf16.msra.mxu0 %v3022_v18  ;;  %v3150_v18 = vld [vmem:[#allocation5 + $0x244] ss:$16 sps:$4 sm:$0xff]  }
 0x110   :  { %1151 = vmatpush2.bf16.msra.mxu1 %v3025_v19  ;;  %1111 = vmatprep.subr.bf16.mxu0 %v3030_v20  ;;  %v3097_v19 = vld [vmem:[#allocation5 + $0x1c0] ss:$16 sps:$4 sm:$0xff]   ;;  %v3102_v20 = vld [vmem:[#allocation5 + $0x1a4] ss:$16 sps:$4 sm:$0xff]  }
 0x111   :  { %1152 = vmatprep.subr.bf16.mxu1 %v3033_v21  ;;  %v3154_v21 = vld [vmem:[#allocation5 + $0x220] ss:$16 sps:$4 sm:$0xff]  }
 0x113   :  { %1112 = vmatpush2.bf16.msra.mxu0 %v3028_v22  ;;  %v3156_v22 = vld [vmem:[#allocation5 + $0x224] ss:$16 sps:$4 sm:$0xff]  }
 0x114   :  { %1153 = vmatpush2.bf16.msra.mxu1 %v3031_v23  ;;  %1113 = vmatprep.subr.bf16.mxu0 %v3036_v24  ;;  %v3100_v23 = vld [vmem:[#allocation5 + $0x1a0] ss:$16 sps:$4 sm:$0xff]   ;;  %v3105_v24 = vld [vmem:[#allocation5 + $0x184] ss:$16 sps:$4 sm:$0xff]  }
 0x115   :  { %1154 = vmatprep.subr.bf16.mxu1 %v3039_v25  ;;  %v3160_v25 = vld [vmem:[#allocation5 + $0x200] ss:$16 sps:$4 sm:$0xff]  }
 0x117   :  { %1114 = vmatpush2.bf16.msra.mxu0 %v3034_v26  ;;  %v3162_v26 = vld [vmem:[#allocation5 + $0x204] ss:$16 sps:$4 sm:$0xff]  }
 0x118   :  { %1155 = vmatpush2.bf16.msra.mxu1 %v3037_v27  ;;  %1115 = vmatprep.subr.bf16.mxu0 %v3042_v28  ;;  %v3103_v27 = vld [vmem:[#allocation5 + $0x180] ss:$16 sps:$4 sm:$0xff]   ;;  %v3108_v28 = vld [vmem:[#allocation5 + $0x164] ss:$16 sps:$4 sm:$0xff]  }
 0x119   :  { %1156 = vmatprep.subr.bf16.mxu1 %v3045_v29  ;;  %v3166_v29 = vld [vmem:[#allocation5 + $0x3e0] ss:$16 sps:$4 sm:$0xff]  }
 0x11b   :  { %1116 = vmatpush2.bf16.msra.mxu0 %v3040_v30  ;;  %v3168_v30 = vld [vmem:[#allocation5 + $0x3e4] ss:$16 sps:$4 sm:$0xff]  }
 0x11c   :  { %1157 = vmatpush2.bf16.msra.mxu1 %v3043_v31  ;;  %1117 = vmatprep.subr.bf16.mxu0 %v3048_v32  ;;  %v3106_v31 = vld [vmem:[#allocation5 + $0x160] ss:$16 sps:$4 sm:$0xff]   ;;  %v3111_v32 = vld [vmem:[#allocation5 + $0x144] ss:$16 sps:$4 sm:$0xff]  }
 0x11d   :  { %1158 = vmatprep.subr.bf16.mxu1 %v3051_v33  ;;  %v3172_v33 = vld [vmem:[#allocation5 + $0x3c0] ss:$16 sps:$4 sm:$0xff]  }
 0x11f   :  { %1118 = vmatpush2.bf16.msra.mxu0 %v3046_v34  ;;  %v3174_v34 = vld [vmem:[#allocation5 + $0x3c4] ss:$16 sps:$4 sm:$0xff]  }
 0x120   :  { %1159 = vmatpush2.bf16.msra.mxu1 %v3049_v35  ;;  %1119 = vmatprep.subr.bf16.mxu0 %v3054_v36  ;;  %v3109_v35 = vld [vmem:[#allocation5 + $0x140] ss:$16 sps:$4 sm:$0xff]   ;;  %v3114_v36 = vld [vmem:[#allocation5 + $0x124] ss:$16 sps:$4 sm:$0xff]  }
 0x121   :  { %1160 = vmatprep.subr.bf16.mxu1 %v3057_v37  ;;  %v3178_v37 = vld [vmem:[#allocation5 + $0x3a0] ss:$16 sps:$4 sm:$0xff]  }
 0x123   :  { %1120 = vmatpush2.bf16.msra.mxu0 %v3052_v38  ;;  %v3180_v38 = vld [vmem:[#allocation5 + $0x3a4] ss:$16 sps:$4 sm:$0xff]  }
 0x124   :  { %1161 = vmatpush2.bf16.msra.mxu1 %v3055_v39  ;;  %1121 = vmatprep.subr.bf16.mxu0 %v3060_v40  ;;  %v3112_v39 = vld [vmem:[#allocation5 + $0x120] ss:$16 sps:$4 sm:$0xff]   ;;  %v3117_v40 = vld [vmem:[#allocation5 + $0x104] ss:$16 sps:$4 sm:$0xff]  }
 0x125   :  { %1162 = vmatprep.subr.bf16.mxu1 %v3063_v41  ;;  %v3184_v41 = vld [vmem:[#allocation5 + $0x380] ss:$16 sps:$4 sm:$0xff]  }
 0x127   :  { %1122 = vmatpush2.bf16.msra.mxu0 %v3058_v42  ;;  %v3186_v42 = vld [vmem:[#allocation5 + $0x384] ss:$16 sps:$4 sm:$0xff]  }
 0x128   :  { %1163 = vmatpush2.bf16.msra.mxu1 %v3061_v43  ;;  %1123 = vmatprep.subr.bf16.mxu0 %v3066_v45  ;;  %v3115_v43 = vld [vmem:[#allocation5 + $0x100] ss:$16 sps:$4 sm:$0xff]   ;;  %v3123_v45 = vld [vmem:[#allocation5 + $0xec] ss:$16 sps:$4 sm:$0xff]  }
 0x129   :  { %1164 = vmatprep.subr.bf16.mxu1 %v3069_v46  ;;  %v3190_v46 = vld [vmem:[#allocation5 + $0x360] ss:$16 sps:$4 sm:$0xff]  }
 0x12b   :  { %1124 = vmatpush2.bf16.msra.mxu0 %v3064_v48  ;;  %v3192_v48 = vld [vmem:[#allocation5 + $0x364] ss:$16 sps:$4 sm:$0xff]  }
 0x12c   :  { %1165 = vmatpush2.bf16.msra.mxu1 %v3067_v49  ;;  %1981 = vmatprep.subr.bf16.mxu0 %v3072_v50  ;;  %v3198_v49 = vld [vmem:[#allocation5 + $0x344] ss:$16 sps:$4 sm:$0xff]   ;;  %v3196_v50 = vld [vmem:[#allocation5 + $0x340] ss:$16 sps:$4 sm:$0xff]  }
 0x12d   :  { %2022 = vmatprep.subr.bf16.mxu1 %v3120_v59 }
 0x12e   :  { %1126 = vmatmul.mubr.bf16.vlgmr.msra.gmra.mxu0 %v3455_v44  ;;  %v3082_v44 = vld [vmem:[#allocation5 + $0x60] ss:$16 sps:$4 sm:$0xff]  }
 0x12f   :  { %1167 = vmatmul.mubr.bf16.vlgmr.msra.gmra.mxu1 %v3457_v47  ;;  %1982 = vmatpush1.bf16.msra.mxu0 %v3070_v51  ;;  %v3087_v47 = vld [vmem:[#allocation5 + $0x44] ss:$16 sps:$4 sm:$0xff]  }
 0x130   :  { %1983 = vmatprep.subr.bf16.mxu0 %v3075_v52  ;;  %2023 = vmatpush1.bf16.msra.mxu1 %v3118_v57  ;;  %v3204_v51 = vld [vmem:[#allocation5 + $0x324] ss:$16 sps:$4 sm:$0xff]   ;;  %v3202_v52 = vld [vmem:[#allocation5 + $0x320] ss:$16 sps:$4 sm:$0xff]  }
 0x131   :  { %2024 = vmatprep.subr.bf16.mxu1 %v3126_v62 }
 0x133   :  { %1984 = vmatpush1.bf16.msra.mxu0 %v3073_v53  ;;  %v3210_v53 = vld [vmem:[#allocation5 + $0x304] ss:$16 sps:$4 sm:$0xff]  }
 0x134   :  { %1985 = vmatprep.subr.bf16.mxu0 %v3078_v54  ;;  %2025 = vmatpush1.bf16.msra.mxu1 %v3124_v61  ;;  %v3208_v54 = vld [vmem:[#allocation5 + $0x300] ss:$16 sps:$4 sm:$0xff]  }
 0x135   :  { %2026 = vmatprep.subr.bf16.mxu1 %v3132_v2 }
 0x137   :  { %1986 = vmatpush1.bf16.msra.mxu0 %v3076_v55  ;;  %v3216_v55 = vld [vmem:[#allocation5 + $0x2ec] ss:$16 sps:$4 sm:$0xff]  }
 0x138   :  { %1987 = vmatprep.subr.bf16.mxu0 %v3081_v56  ;;  %2027 = vmatpush1.bf16.msra.mxu1 %v3130_v1  ;;  %v3466_v56 = vld [vmem:[%s3601_s4] sm:$0xf] }
 0x139   :  { %2028 = vmatprep.subr.bf16.mxu1 %v3138_v6  ;;  %v354_v57 = vrot.slane %v3466_v56, %v3440_v13 }
 0x13b   :  { %1988 = vmatpush1.bf16.msra.mxu0 %v3079_v58  ;;  %v358_v58 = vrot.slane %v3466_v56, %v3447_v16 }
 0x13c   :  { %1989 = vmatprep.subr.bf16.mxu0 %v3084_v60  ;;  %2029 = vmatpush1.bf16.msra.mxu1 %v3136_v5 }
 0x13d   :  { %2030 = vmatprep.subr.bf16.mxu1 %v3144_v10  ;;  %v3121_v10 = vld [vmem:[#allocation5 + $0xe8] ss:$16 sps:$4 sm:$0xff]  }
 0x13f   :  { %1990 = vmatpush1.bf16.msra.mxu0 %v3082_v44 }
 0x140   :  { %1991 = vmatprep.subr.bf16.mxu0 %v3087_v47  ;;  %2031 = vmatpush1.bf16.msra.mxu1 %v3142_v9 }
 0x141   :  { %2032 = vmatprep.subr.bf16.mxu1 %v3150_v18  ;;  %v3135_v18 = vld [vmem:[#allocation5 + $0xac] ss:$16 sps:$4 sm:$0xff]  }
 0x143   :  { %1992 = vmatpush1.bf16.msra.mxu0 %v3085_v63 }
 0x144   :  { %1993 = vmatprep.subr.bf16.mxu0 %v3090_v0  ;;  %2033 = vmatpush1.bf16.msra.mxu1 %v3148_v15  ;;  %v3127_v15 = vld [vmem:[#allocation5 + $0xc8] ss:$16 sps:$4 sm:$0xff]  }
 0x145   :  { %2034 = vmatprep.subr.bf16.mxu1 %v3156_v22  ;;  %v3147_v22 = vld [vmem:[#allocation5 + $0x6c] ss:$16 sps:$4 sm:$0xff]  }
 0x147   :  { %1994 = vmatpush1.bf16.msra.mxu0 %v3088_v3 }
 0x148   :  { %1995 = vmatprep.subr.bf16.mxu0 %v3093_v4  ;;  %2035 = vmatpush1.bf16.msra.mxu1 %v3154_v21  ;;  %v3139_v21 = vld [vmem:[#allocation5 + $0x88] ss:$16 sps:$4 sm:$0xff]  }
 0x149   :  { %2036 = vmatprep.subr.bf16.mxu1 %v3162_v26  ;;  %v3159_v26 = vld [vmem:[#allocation5 + $0x2c] ss:$16 sps:$4 sm:$0xff]  }
 0x14b   :  { %1996 = vmatpush1.bf16.msra.mxu0 %v3091_v7 }
 0x14c   :  { %1997 = vmatprep.subr.bf16.mxu0 %v3096_v8  ;;  %2037 = vmatpush1.bf16.msra.mxu1 %v3160_v25  ;;  %v3151_v25 = vld [vmem:[#allocation5 + $0x48] ss:$16 sps:$4 sm:$0xff]  }
 0x14d   :  { %2038 = vmatprep.subr.bf16.mxu1 %v3168_v30  ;;  %v3171_v30 = vld [vmem:[#allocation5 + $0x1ec] ss:$16 sps:$4 sm:$0xff]  }
 0x14f   :  { %1998 = vmatpush2.bf16.msra.mxu0 %v3094_v11 }
 0x150   :  { %1999 = vmatprep.subr.bf16.mxu0 %v3099_v12  ;;  %2039 = vmatpush2.bf16.msra.mxu1 %v3166_v29  ;;  %v3129_v12 = vld [vmem:[#allocation5 + $0xcc] ss:$16 sps:$4 sm:$0xff]   ;;  %v3163_v29 = vld [vmem:[#allocation5 + $0x8] ss:$16 sps:$4 sm:$0xff]  }
 0x151   :  { %2040 = vmatprep.subr.bf16.mxu1 %v3174_v34  ;;  %v3183_v34 = vld [vmem:[#allocation5 + $0x1ac] ss:$16 sps:$4 sm:$0xff]  }
 0x153   :  { %2000 = vmatpush2.bf16.msra.mxu0 %v3097_v19  ;;  %v3133_v19 = vld [vmem:[#allocation5 + $0xa8] ss:$16 sps:$4 sm:$0xff]  }
 0x154   :  { %2001 = vmatprep.subr.bf16.mxu0 %v3102_v20  ;;  %2041 = vmatpush2.bf16.msra.mxu1 %v3172_v33  ;;  %v3141_v20 = vld [vmem:[#allocation5 + $0x8c] ss:$16 sps:$4 sm:$0xff]   ;;  %v3175_v33 = vld [vmem:[#allocation5 + $0x1c8] ss:$16 sps:$4 sm:$0xff]  }
 0x155   :  { %2042 = vmatprep.subr.bf16.mxu1 %v3180_v38  ;;  %v3195_v38 = vld [vmem:[#allocation5 + $0x16c] ss:$16 sps:$4 sm:$0xff]  }
 0x157   :  { %2002 = vmatpush2.bf16.msra.mxu0 %v3100_v23  ;;  %v3145_v23 = vld [vmem:[#allocation5 + $0x68] ss:$16 sps:$4 sm:$0xff]  }
 0x158   :  { %2003 = vmatprep.subr.bf16.mxu0 %v3105_v24  ;;  %2043 = vmatpush2.bf16.msra.mxu1 %v3178_v37  ;;  %v3153_v24 = vld [vmem:[#allocation5 + $0x4c] ss:$16 sps:$4 sm:$0xff]   ;;  %v3187_v37 = vld [vmem:[#allocation5 + $0x188] ss:$16 sps:$4 sm:$0xff]  }
 0x159   :  { %2044 = vmatprep.subr.bf16.mxu1 %v3186_v42  ;;  %v3199_v42 = vld [vmem:[#allocation5 + $0x148] ss:$16 sps:$4 sm:$0xff]  }
 0x15b   :  { %2004 = vmatpush2.bf16.msra.mxu0 %v3103_v27  ;;  %v3157_v27 = vld [vmem:[#allocation5 + $0x28] ss:$16 sps:$4 sm:$0xff]  }
 0x15c   :  { %2005 = vmatprep.subr.bf16.mxu0 %v3108_v28  ;;  %2045 = vmatpush2.bf16.msra.mxu1 %v3184_v41  ;;  %v3165_v28 = vld [vmem:[#allocation5 + $0xc] ss:$16 sps:$4 sm:$0xff]   ;;  %v362_v41 = vrot.slane %v3466_v56, %v3442_v14 }
 0x15d   :  { %2046 = vmatprep.subr.bf16.mxu1 %v3192_v48 }
 0x15f   :  { %2006 = vmatpush2.bf16.msra.mxu0 %v3106_v31  ;;  %v3169_v31 = vld [vmem:[#allocation5 + $0x1e8] ss:$16 sps:$4 sm:$0xff]  }
 0x160   :  { %2007 = vmatprep.subr.bf16.mxu0 %v3111_v32  ;;  %2047 = vmatpush2.bf16.msra.mxu1 %v3190_v46  ;;  %v3177_v32 = vld [vmem:[#allocation5 + $0x1cc] ss:$16 sps:$4 sm:$0xff]  }
 0x161   :  { %2048 = vmatprep.subr.bf16.mxu1 %v3198_v49 }
 0x163   :  { %2008 = vmatpush2.bf16.msra.mxu0 %v3109_v35  ;;  %v3181_v35 = vld [vmem:[#allocation5 + $0x1a8] ss:$16 sps:$4 sm:$0xff]  }
 0x164   :  { %2009 = vmatprep.subr.bf16.mxu0 %v3114_v36  ;;  %2049 = vmatpush2.bf16.msra.mxu1 %v3196_v50  ;;  %v3189_v36 = vld [vmem:[#allocation5 + $0x18c] ss:$16 sps:$4 sm:$0xff]  }
 0x165   :  { %2050 = vmatprep.subr.bf16.mxu1 %v3204_v51  ;;  %v3205_v51 = vld [vmem:[#allocation5 + $0x128] ss:$16 sps:$4 sm:$0xff]  }
 0x167   :  { %2010 = vmatpush2.bf16.msra.mxu0 %v3112_v39  ;;  %v3193_v39 = vld [vmem:[#allocation5 + $0x168] ss:$16 sps:$4 sm:$0xff]  }
 0x168   :  { %2011 = vmatprep.subr.bf16.mxu0 %v3117_v40  ;;  %2051 = vmatpush2.bf16.msra.mxu1 %v3202_v52  ;;  %v3201_v40 = vld [vmem:[#allocation5 + $0x14c] ss:$16 sps:$4 sm:$0xff]  }
 0x169   :  { %2052 = vmatprep.subr.bf16.mxu1 %v3210_v53 }
 0x16b   :  { %2012 = vmatpush2.bf16.msra.mxu0 %v3115_v43  ;;  %v366_v43 = vrot.slane %v3466_v56, %v3449_v17  ;;  %v3211_v56 = vld [vmem:[#allocation5 + $0x108] ss:$16 sps:$4 sm:$0xff]  }
 0x16c   :  { %2063 = vmatprep.subr.bf16.mxu0 %v3123_v45  ;;  %2053 = vmatpush2.bf16.msra.mxu1 %v3208_v54  ;;  %v3207_v45 = vld [vmem:[#allocation5 + $0x12c] ss:$16 sps:$4 sm:$0xff]  }
 0x16d   :  { %2104 = vmatprep.subr.bf16.mxu1 %v3216_v55  ;;  %v3213_v55 = vld [vmem:[#allocation5 + $0x10c] ss:$16 sps:$4 sm:$0xff]  }
 0x1ae   :  { %v1045_v59 = vpop.f32.mrf.mxu0 }
 0x1af   :  { %v1046_v60 = vadd.f32 %v1045_v59, %v354_v57  ;;  %v1086_v44 = vpop.f32.mrf.mxu1 }
 0x1b0   :  { %v1047_v47 = vpop.f32.mrf.mxu0 }
 0x1b1   :  { %v1087_v61 = vadd.f32 %v1086_v44, %v1046_v60  ;;  %v1048_v62 = vadd.f32 %v1047_v47, %v358_v58  ;;  %v1088_v63 = vpop.f32.mrf.mxu1 }
 0x1b2   :  { %v1049_v0 = vpop.f32.mrf.mxu0 }
 0x1b3   :  { %vm1175_vm6 = vcmp.gt.f32.partialorder %v1087_v61, 0.0  ;;  %v1179_v1 = vmul.f32 0.01, %v1087_v61  ;;  %v1089_v2 = vadd.f32 %v1088_v63, %v1048_v62  ;;  %v1090_v3 = vpop.f32.mrf.mxu1 }
 0x1b4   :  { %v1050_v4 = vpop.f32.mrf.mxu0  ;;  %v3219_v3 = vld [vmem:[#allocation5 + $0x2cc] ss:$16 sps:$4 sm:$0xff]  }
 0x1b5   :  { %vm1176_vm7 = vcmp.gt.f32.partialorder %v1089_v2, 0.0  ;;  %v1180_v5 = vmul.f32 0.01, %v1089_v2  ;;  %v1091_v6 = vpop.f32.mrf.mxu1  ;;  %v1183_v7 = vsel %vm1175_vm6, %v1087_v61, %v1179_v1  ;;  %v3214_v1 = vld [vmem:[#allocation5 + $0x2e8] ss:$16 sps:$4 sm:$0xff]  }
 0x1b6   :  { %v3472_v11 = vpack.c.bf16 %v1183_v7, %v1183_v7  ;;  %v3217_v4 = vld [vmem:[#allocation5 + $0x2c8] ss:$16 sps:$4 sm:$0xff]   ;;  %v3225_v7 = vld [vmem:[#allocation5 + $0x28c] ss:$16 sps:$4 sm:$0xff]  }
 0x1b7   :  { %v1184_v8 = vsel %vm1176_vm7, %v1089_v2, %v1180_v5  ;;  %v3222_v5 = vld [vmem:[#allocation5 + $0x2ac] ss:$16 sps:$4 sm:$0xff]   ;;  %v3220_v6 = vld [vmem:[#allocation5 + $0x2a8] ss:$16 sps:$4 sm:$0xff]  }
 0x1b8   :  { %v1188_v9 = vpack.c.bf16 %v1184_v8, %v1184_v8  ;;  %v3262_v8 = vld [vmem:[%s3604_s7 + $0x78] sm:$0xff]  }
 0x1ba   :  { %2013 = vmatprep.mubr.bf16.mxu0 %v1188_v9 }
 0x1bb   :  { %2014 = vmatmul.mubr.bf16.vlgmr.msra.gmra.mxu0 %v3472_v11 }
 0x1bc   :  { %2064 = vmatpush1.bf16.msra.mxu0 %v3121_v10  ;;  %2095 = vmatprep.mubr.bf16.mxu0 %v1188_v9  ;;  %v3263_v9 = vld [vmem:[%s3604_s7 + $0x38] sm:$0xff]   ;;  %v3264_v10 = vld [vmem:[%s3604_s7 + $0x70] sm:$0xff]  }
 0x1bd   :  { %2065 = vmatprep.subr.bf16.mxu0 %v3129_v12  ;;  %v3265_v12 = vld [vmem:[%s3604_s7 + $0x30] sm:$0xff]  }
 0x1c0   :  { %2066 = vmatpush1.bf16.msra.mxu0 %v3127_v15  ;;  %v3228_v15 = vld [vmem:[#allocation5 + $0x26c] ss:$16 sps:$4 sm:$0xff]  }
 0x1c1   :  { %2067 = vmatprep.subr.bf16.mxu0 %v3135_v18  ;;  %v3266_v18 = vld [vmem:[%s3604_s7 + $0x68] sm:$0xff]  }
 0x1c4   :  { %2068 = vmatpush1.bf16.msra.mxu0 %v3133_v19  ;;  %v3226_v19 = vld [vmem:[#allocation5 + $0x268] ss:$16 sps:$4 sm:$0xff]  }
 0x1c5   :  { %2069 = vmatprep.subr.bf16.mxu0 %v3141_v20  ;;  %v3267_v20 = vld [vmem:[%s3604_s7 + $0x28] sm:$0xff]  }
 0x1c8   :  { %2070 = vmatpush1.bf16.msra.mxu0 %v3139_v21  ;;  %v3231_v21 = vld [vmem:[#allocation5 + $0x24c] ss:$16 sps:$4 sm:$0xff]  }
 0x1c9   :  { %2071 = vmatprep.subr.bf16.mxu0 %v3147_v22  ;;  %v3268_v22 = vld [vmem:[%s3604_s7 + $0x60] sm:$0xff]  }
 0x1cc   :  { %2072 = vmatpush1.bf16.msra.mxu0 %v3145_v23  ;;  %v3229_v23 = vld [vmem:[#allocation5 + $0x248] ss:$16 sps:$4 sm:$0xff]  }
 0x1cd   :  { %2073 = vmatprep.subr.bf16.mxu0 %v3153_v24  ;;  %v3269_v24 = vld [vmem:[%s3604_s7 + $0x20] sm:$0xff]  }
 0x1d0   :  { %2074 = vmatpush1.bf16.msra.mxu0 %v3151_v25  ;;  %v3234_v25 = vld [vmem:[#allocation5 + $0x22c] ss:$16 sps:$4 sm:$0xff]  }
 0x1d1   :  { %2075 = vmatprep.subr.bf16.mxu0 %v3159_v26  ;;  %v3270_v26 = vld [vmem:[%s3604_s7 + $0x58] sm:$0xff]  }
 0x1d4   :  { %2076 = vmatpush1.bf16.msra.mxu0 %v3157_v27  ;;  %v3232_v27 = vld [vmem:[#allocation5 + $0x228] ss:$16 sps:$4 sm:$0xff]  }
 0x1d5   :  { %2077 = vmatprep.subr.bf16.mxu0 %v3165_v28  ;;  %v3271_v28 = vld [vmem:[%s3604_s7 + $0x18] sm:$0xff]  }
 0x1d8   :  { %2078 = vmatpush1.bf16.msra.mxu0 %v3163_v29  ;;  %v3237_v29 = vld [vmem:[#allocation5 + $0x20c] ss:$16 sps:$4 sm:$0xff]  }
 0x1d9   :  { %2079 = vmatprep.subr.bf16.mxu0 %v3171_v30  ;;  %v3272_v30 = vld [vmem:[%s3604_s7 + $0x50] sm:$0xff]  }
 0x1dc   :  { %2080 = vmatpush2.bf16.msra.mxu0 %v3169_v31  ;;  %v3235_v31 = vld [vmem:[#allocation5 + $0x208] ss:$16 sps:$4 sm:$0xff]  }
 0x1dd   :  { %2081 = vmatprep.subr.bf16.mxu0 %v3177_v32  ;;  %v3240_v32 = vld [vmem:[#allocation5 + $0x3ec] ss:$16 sps:$4 sm:$0xff]  }
 0x1e0   :  { %2082 = vmatpush2.bf16.msra.mxu0 %v3175_v33  ;;  %v3238_v33 = vld [vmem:[#allocation5 + $0x3e8] ss:$16 sps:$4 sm:$0xff]  }
 0x1e1   :  { %2083 = vmatprep.subr.bf16.mxu0 %v3183_v34  ;;  %v3243_v34 = vld [vmem:[#allocation5 + $0x3cc] ss:$16 sps:$4 sm:$0xff]  }
 0x1e4   :  { %2084 = vmatpush2.bf16.msra.mxu0 %v3181_v35  ;;  %v3241_v35 = vld [vmem:[#allocation5 + $0x3c8] ss:$16 sps:$4 sm:$0xff]  }
 0x1e5   :  { %2085 = vmatprep.subr.bf16.mxu0 %v3189_v36  ;;  %v3246_v36 = vld [vmem:[#allocation5 + $0x3ac] ss:$16 sps:$4 sm:$0xff]  }
 0x1e8   :  { %2086 = vmatpush2.bf16.msra.mxu0 %v3187_v37  ;;  %v3244_v37 = vld [vmem:[#allocation5 + $0x3a8] ss:$16 sps:$4 sm:$0xff]  }
 0x1e9   :  { %2087 = vmatprep.subr.bf16.mxu0 %v3195_v38  ;;  %v3249_v38 = vld [vmem:[#allocation5 + $0x38c] ss:$16 sps:$4 sm:$0xff]  }
 0x1ec   :  { %2088 = vmatpush2.bf16.msra.mxu0 %v3193_v39  ;;  %v3247_v39 = vld [vmem:[#allocation5 + $0x388] ss:$16 sps:$4 sm:$0xff]  }
 0x1ed   :  { %2089 = vmatprep.subr.bf16.mxu0 %v3201_v40  ;;  %v3252_v40 = vld [vmem:[#allocation5 + $0x36c] ss:$16 sps:$4 sm:$0xff]  }
 0x1ee   :  { %v1127_v46 = vpop.f32.mrf.mxu0 }
 0x1ef   :  { %v1128_v48 = vadd.f32 %v1127_v46, %v362_v41  ;;  %v1168_v49 = vpop.f32.mrf.mxu1  ;;  %v3250_v41 = vld [vmem:[#allocation5 + $0x368] ss:$16 sps:$4 sm:$0xff]  }
 0x1f0   :  { %v1129_v50 = vpop.f32.mrf.mxu0  ;;  %2090 = vmatpush2.bf16.msra.mxu0 %v3199_v42  ;;  %v3255_v42 = vld [vmem:[#allocation5 + $0x34c] ss:$16 sps:$4 sm:$0xff]   ;;  %v3256_v46 = vld [vmem:[#allocation5 + $0x328] ss:$16 sps:$4 sm:$0xff]  }
 0x1f1   :  { %v1169_v52 = vadd.f32 %v1168_v49, %v1128_v48  ;;  %v1130_v53 = vadd.f32 %v1129_v50, %v366_v43  ;;  %v1170_v54 = vpop.f32.mrf.mxu1  ;;  %2091 = vmatprep.subr.bf16.mxu0 %v3207_v45  ;;  %v3253_v43 = vld [vmem:[#allocation5 + $0x348] ss:$16 sps:$4 sm:$0xff]   ;;  %v3258_v45 = vld [vmem:[#allocation5 + $0x32c] ss:$16 sps:$4 sm:$0xff]   ;;  %v3273_v50 = vld [vmem:[%s3604_s7 + $0x10] sm:$0xff]  }
 0x1f2   :  { %v1131_v57 = vpop.f32.mrf.mxu0  ;;  %v3261_v48 = vld [vmem:[#allocation5 + $0x30c] ss:$16 sps:$4 sm:$0xff]   ;;  %v3259_v49 = vld [vmem:[#allocation5 + $0x308] ss:$16 sps:$4 sm:$0xff]  }
 0x1f3   :  { %vm1177_vm8 = vcmp.gt.f32.partialorder %v1169_v52, 0.0  ;;  %v1181_v58 = vmul.f32 0.01, %v1169_v52  ;;  %v1171_v59 = vadd.f32 %v1170_v54, %v1130_v53  ;;  %v1172_v60 = vpop.f32.mrf.mxu1  ;;  %v3276_v53 = vld [vmem:[%s3604_s7 + $0x40] sm:$0xff]   ;;  %v3279_v57 = vld [vmem:[%s3604_s7 + $0xb8] sm:$0xff]  }
 0x1f4   :  { %v1132_v44 = vpop.f32.mrf.mxu0  ;;  %2092 = vmatpush2.bf16.msra.mxu0 %v3205_v51  ;;  %v3274_v51 = vld [vmem:[%s3604_s7 + $0x48] sm:$0xff]   ;;  %v3277_v54 = vld [vmem:[%s3604_s7] sm:$0xff]  }
 0x1f5   :  { %vm1178_vm9 = vcmp.gt.f32.partialorder %v1171_v59, 0.0  ;;  %v1182_v47 = vmul.f32 0.01, %v1171_v59  ;;  %v1173_v61 = vpop.f32.mrf.mxu1  ;;  %2093 = vmatprep.subr.bf16.mxu0 %v3213_v55  ;;  %v1185_v62 = vsel %vm1177_vm8, %v1169_v52, %v1181_v58  ;;  %v3275_v52 = vld [vmem:[%s3604_s7 + $0x8] sm:$0xff]   ;;  %v3278_v55 = vld [vmem:[%s3604_s7 + $0xf8] sm:$0xff]   ;;  %v3280_v58 = vld [vmem:[%s3604_s7 + $0xf0] sm:$0xff]  }
 0x1f6   :  { %v3479_v2 = vpack.c.bf16 %v1185_v62, %v1185_v62  ;;  %v3282_v60 = vld [vmem:[%s3604_s7 + $0xe8] sm:$0xff]   ;;  %v3286_v61 = vld [vmem:[%s3604_s7 + $0xd8] sm:$0xff]  }
 0x1f7   :  { %v1186_v63 = vsel %vm1178_vm9, %v1171_v59, %v1182_v47  ;;  %v3281_v59 = vld [vmem:[%s3604_s7 + $0xb0] sm:$0xff]   ;;  %v3283_v44 = vld [vmem:[%s3604_s7 + $0xa8] sm:$0xff]   ;;  %v3285_v47 = vld [vmem:[%s3604_s7 + $0xa0] sm:$0xff]  }
 0x1f8   :  { %2094 = vmatpush2.bf16.msra.mxu0 %v3211_v56  ;;  %v1190_v0 = vpack.c.bf16 %v1186_v63, %v1186_v63  ;;  %v3284_v56 = vld [vmem:[%s3604_s7 + $0xe0] sm:$0xff]   ;;  %v3287_v62 = vld [vmem:[%s3604_s7 + $0x98] sm:$0xff]   ;;  %v3288_v63 = vld [vmem:[%s3604_s7 + $0xd0] sm:$0xff]  }
 0x1f9   :  { %2822 = vmatprep.subr.bf16.mxu0 %v3262_v8  ;;  %v3293_v8 = vld [vmem:[%s3604_s7 + $0x80] sm:$0xff]  }
 0x1fa   :  { %2054 = vmatprep.mubr.bf16.mxu1 %v1190_v0 }
 0x1fb   :  { %2055 = vmatmul.mubr.bf16.vlgmr.msra.gmra.mxu1 %v3479_v2  ;;  %2096 = vmatmul.mubr.bf16.vlgmr.msra.gmra.mxu0 %v3472_v11  ;;  %v3223_v11 = vld [vmem:[#allocation5 + $0x288] ss:$16 sps:$4 sm:$0xff]  }
 0x1fc   :  { %2105 = vmatpush1.bf16.msra.mxu1 %v3214_v1  ;;  %2136 = vmatprep.mubr.bf16.mxu1 %v1190_v0  ;;  %v3289_v0 = vld [vmem:[%s3604_s7 + $0x90] sm:$0xff]  }
 0x1fd   :  { %2106 = vmatprep.subr.bf16.mxu1 %v3219_v3  ;;  %2823 = vmatpush3.bf16.msra.mxu0 %v3263_v9  ;;  %v1319_v9 = vld [vmem:[%s3603_s6] sm:$0xf] }
 0x1fe   :  { %2824 = vmatprep.subr.bf16.mxu0 %v3264_v10  ;;  %v1324_v10 = vrot.slane %v1319_v9, %v3440_v13 }
 0x200   :  { %2107 = vmatpush1.bf16.msra.mxu1 %v3217_v4  ;;  %v3291_v4 = vld [vmem:[%s3604_s7 + $0x88] sm:$0xff]  }
 0x201   :  { %2108 = vmatprep.subr.bf16.mxu1 %v3222_v5  ;;  %2825 = vmatpush3.bf16.msra.mxu0 %v3265_v12 }
 0x202   :  { %2826 = vmatprep.subr.bf16.mxu0 %v3266_v18 }
 0x204   :  { %2109 = vmatpush1.bf16.msra.mxu1 %v3220_v6  ;;  %v3292_v6 = vld [vmem:[%s3604_s7 + $0xc0] sm:$0xff]  }
 0x205   :  { %2110 = vmatprep.subr.bf16.mxu1 %v3225_v7  ;;  %2827 = vmatpush3.bf16.msra.mxu0 %v3267_v20 }
 0x206   :  { %2828 = vmatprep.subr.bf16.mxu0 %v3268_v22 }
 0x208   :  { %2111 = vmatpush1.bf16.msra.mxu1 %v3223_v11  ;;  %v1328_v11 = vrot.slane %v1319_v9, %v3447_v16 }
 0x209   :  { %2112 = vmatprep.subr.bf16.mxu1 %v3228_v15  ;;  %2829 = vmatpush3.bf16.msra.mxu0 %v3269_v24 }
 0x20a   :  { %2830 = vmatprep.subr.bf16.mxu0 %v3270_v26 }
 0x20c   :  { %2113 = vmatpush1.bf16.msra.mxu1 %v3226_v19 }
 0x20d   :  { %2114 = vmatprep.subr.bf16.mxu1 %v3231_v21  ;;  %2831 = vmatpush3.bf16.msra.mxu0 %v3271_v28 }
 0x20e   :  { %2832 = vmatprep.subr.bf16.mxu0 %v3272_v30 }
 0x210   :  { %2115 = vmatpush1.bf16.msra.mxu1 %v3229_v23 }
 0x211   :  { %2116 = vmatprep.subr.bf16.mxu1 %v3234_v25  ;;  %2833 = vmatpush3.bf16.msra.mxu0 %v3273_v50 }
 0x212   :  { %2834 = vmatprep.subr.bf16.mxu0 %v3274_v51 }
 0x214   :  { %2117 = vmatpush1.bf16.msra.mxu1 %v3232_v27 }
 0x215   :  { %2118 = vmatprep.subr.bf16.mxu1 %v3237_v29  ;;  %2835 = vmatpush3.bf16.msra.mxu0 %v3275_v52 }
 0x216   :  { %2836 = vmatprep.subr.bf16.mxu0 %v3276_v53  ;;  %v2789_v53 = vld [vmem:[%s3605_s8] ss:$0 sm:$0xff]  ;;  %s3335_s8 = scalar_lea.vmem %s2516_s25, 128 }
 0x217   :  { %p3336_p10 = scmp.ne.s32.totalorder %s2516_s25, %s3335_s8  ;;  %p3341_p12 = scmp.lt.s32.totalorder %s3335_s8, %s3335_s8 }
 0x218   :  { %2119 = vmatpush1.bf16.msra.mxu1 %v3235_v31 }
 0x219   :  { %2120 = vmatprep.subr.bf16.mxu1 %v3240_v32  ;;  %2837 = vmatpush3.bf16.msra.mxu0 %v3277_v54  ;;  %v1332_v32 = vrot.slane %v1319_v9, %v3442_v14  ;;  %p3342_p13 = por %p3341_p12, %p3340_p11 }
 0x21b   :  { %p3343_p0 = pnand %p3342_p13, %p3336_p10 }
 0x21c   :  { %2121 = vmatpush2.bf16.msra.mxu1 %v3238_v33  ;;  %v1336_v33 = vrot.slane %v1319_v9, %v3449_v17 }
 0x21d   :  { %2122 = vmatprep.subr.bf16.mxu1 %v3243_v34 }
 0x220   :  { %2123 = vmatpush2.bf16.msra.mxu1 %v3241_v35 }
 0x221   :  { %2124 = vmatprep.subr.bf16.mxu1 %v3246_v36 }
 0x224   :  { %2125 = vmatpush2.bf16.msra.mxu1 %v3244_v37 }
 0x225   :  { %2126 = vmatprep.subr.bf16.mxu1 %v3249_v38 }
 0x228   :  { %2127 = vmatpush2.bf16.msra.mxu1 %v3247_v39 }
 0x229   :  { %2128 = vmatprep.subr.bf16.mxu1 %v3252_v40 }
 0x22c   :  { %2129 = vmatpush2.bf16.msra.mxu1 %v3250_v41 }
 0x22d   :  { %2130 = vmatprep.subr.bf16.mxu1 %v3255_v42 }
 0x230   :  { %2131 = vmatpush2.bf16.msra.mxu1 %v3253_v43 }
 0x231   :  { %2132 = vmatprep.subr.bf16.mxu1 %v3258_v45 }
 0x234   :  { %2133 = vmatpush2.bf16.msra.mxu1 %v3256_v46 }
 0x235   :  { %2134 = vmatprep.subr.bf16.mxu1 %v3261_v48 }
 0x238   :  { %2135 = vmatpush2.bf16.msra.mxu1 %v3259_v49 }
 0x239   :  { %2844 = vmatprep.subr.bf16.mxu1 %v3278_v55 }
 0x23b   :  { %2137 = vmatmul.mubr.bf16.vlgmr.msra.gmra.mxu1 %v3479_v2  ;;  %v3290_v2 = vld [vmem:[%s3604_s7 + $0xc8] sm:$0xff]  }
 0x23c   :  { %2845 = vmatpush3.bf16.msra.mxu1 %v3279_v57 }
 0x23d   :  { %2846 = vmatprep.subr.bf16.mxu1 %v3280_v58 }
 0x240   :  { %2847 = vmatpush3.bf16.msra.mxu1 %v3281_v59  ;;  %v3294_v59 = vld [vmem:[%s3597_s0] sm:$0xff] }
 0x241   :  { %2848 = vmatprep.subr.bf16.mxu1 %v3282_v60  ;;  %vm2504_vm14 = vcmp.eq.f32.partialorder %v3294_v59, 0.0 }
 0x244   :  { %2849 = vmatpush3.bf16.msra.mxu1 %v3283_v44 }
 0x245   :  { %2850 = vmatprep.subr.bf16.mxu1 %v3284_v56 }
 0x248   :  { %2851 = vmatpush3.bf16.msra.mxu1 %v3285_v47 }
 0x249   :  { %2852 = vmatprep.subr.bf16.mxu1 %v3286_v61 }
 0x24c   :  { %2853 = vmatpush3.bf16.msra.mxu1 %v3287_v62 }
 0x24d   :  { %2854 = vmatprep.subr.bf16.mxu1 %v3288_v63 }
 0x250   :  { %2855 = vmatpush3.bf16.msra.mxu1 %v3289_v0 }
 0x251   :  { %2856 = vmatprep.subr.bf16.mxu1 %v3290_v2 }
 0x254   :  { %2857 = vmatpush3.bf16.msra.mxu1 %v3291_v4 }
 0x255   :  { %2858 = vmatprep.subr.bf16.mxu1 %v3292_v6 }
 0x258   :  { %2859 = vmatpush3.bf16.msra.mxu1 %v3293_v8 }
 0x27b   :  { %v2015_v1 = vpop.f32.mrf.mxu0 }
 0x27c   :  { %v2016_v12 = vadd.f32 %v2015_v1, %v1324_v10 }
 0x27d   :  { %v2017_v3 = vpop.f32.mrf.mxu0 }
 0x27e   :  { %v2018_v19 = vadd.f32 %v2017_v3, %v1328_v11 }
 0x27f   :  { %v2019_v5 = vpop.f32.mrf.mxu0 }
 0x281   :  { %v2020_v7 = vpop.f32.mrf.mxu0 }
 0x2bb   :  { %v2056_v15 = vpop.f32.mrf.mxu1  ;;  %v2097_v18 = vpop.f32.mrf.mxu0 }
 0x2bc   :  { %v2057_v20 = vadd.f32 %v2056_v15, %v2016_v12  ;;  %v2098_v34 = vadd.f32 %v2097_v18, %v1332_v32 }
 0x2bd   :  { %v2058_v21 = vpop.f32.mrf.mxu1  ;;  %v2099_v22 = vpop.f32.mrf.mxu0 }
 0x2be   :  { %vm2145_vm10 = vcmp.gt.f32.partialorder %v2057_v20, 0.0  ;;  %v2149_v23 = vmul.f32 0.01, %v2057_v20  ;;  %v2059_v24 = vadd.f32 %v2058_v21, %v2018_v19  ;;  %v2100_v36 = vadd.f32 %v2099_v22, %v1336_v33 }
 0x2bf   :  { %v2060_v25 = vpop.f32.mrf.mxu1  ;;  %v2101_v26 = vpop.f32.mrf.mxu0 }
 0x2c0   :  { %vm2146_vm11 = vcmp.gt.f32.partialorder %v2059_v24, 0.0  ;;  %v2150_v27 = vmul.f32 0.01, %v2059_v24  ;;  %v2153_v28 = vsel %vm2145_vm10, %v2057_v20, %v2149_v23 }
 0x2c1   :  { %v2061_v29 = vpop.f32.mrf.mxu1  ;;  %v2102_v30 = vpop.f32.mrf.mxu0  ;;  %v2157_v16 = vpack.c.bf16 %v2153_v28, %v2153_v28 }
 0x2c2   :  { %v2154_v13 = vsel %vm2146_vm11, %v2059_v24, %v2150_v27 }
 0x2c3   :  { %v2158_v31 = vpack.c.bf16 %v2154_v13, %v2154_v13 }
 0x2c5   :  { %2456 = vmatprep.mubr.bf16.mxu0 %v2158_v31 }
 0x2c6   :  { %2457 = vmatmul.mubr.bf16.vlgmr.msra.gmra.mxu0 %v2157_v16 }
 0x2fb   :  { %v2138_v35 = vpop.f32.mrf.mxu1 }
 0x2fc   :  { %v2139_v37 = vadd.f32 %v2138_v35, %v2098_v34 }
 0x2fd   :  { %v2140_v38 = vpop.f32.mrf.mxu1 }
 0x2fe   :  { %vm2147_vm12 = vcmp.gt.f32.partialorder %v2139_v37, 0.0  ;;  %v2151_v39 = vmul.f32 0.01, %v2139_v37  ;;  %v2141_v40 = vadd.f32 %v2140_v38, %v2100_v36 }
 0x2ff   :  { %v2142_v41 = vpop.f32.mrf.mxu1 }
 0x300   :  { %vm2148_vm13 = vcmp.gt.f32.partialorder %v2141_v40, 0.0  ;;  %v2152_v42 = vmul.f32 0.01, %v2141_v40  ;;  %v2155_v43 = vsel %vm2147_vm12, %v2139_v37, %v2151_v39 }
 0x301   :  { %v2143_v45 = vpop.f32.mrf.mxu1  ;;  %v2159_v49 = vpack.c.bf16 %v2155_v43, %v2155_v43 }
 0x302   :  { %v2156_v46 = vsel %vm2148_vm13, %v2141_v40, %v2152_v42 }
 0x303   :  { %v2160_v48 = vpack.c.bf16 %v2156_v46, %v2156_v46 }
 0x305   :  { %2496 = vmatprep.mubr.bf16.mxu1 %v2160_v48 }
 0x306   :  { %2497 = vmatmul.mubr.bf16.vlgmr.msra.gmra.mxu1 %v2159_v49 }
 0x386   :  { %v2838_v14 = vpop.f32.mrf.mxu0 }
 0x388   :  { %v2839_v17 = vpop.f32.mrf.mxu0 }
 0x389   :  { %v2840_v52 = vadd.f32 %v2839_v17, %v2838_v14 }
 0x38a   :  { %v2841_v50 = vpop.f32.mrf.mxu0 }
 0x38b   :  { %v2459_v57 = vadd.f32 %v2840_v52, %v2789_v53 }
 0x38c   :  { %v2842_v51 = vpop.f32.mrf.mxu0 }
 0x3c6   :  { %v2860_v54 = vpop.f32.mrf.mxu1 }
 0x3c8   :  { %v2861_v55 = vpop.f32.mrf.mxu1 }
 0x3c9   :  { %v2862_v58 = vadd.f32 %v2861_v55, %v2860_v54 }
 0x3ca   :  { %v2863_v60 = vpop.f32.mrf.mxu1 }
 0x3cb   :  { %v2499_v44 = vadd.f32 %v2862_v58, %v2459_v57 }
 0x3cc   :  { %v2864_v56 = vpop.f32.mrf.mxu1 }
 0x3cd   :  { %v2505_v47 = vsel %vm2504_vm14, -5.0, %v2499_v44 }
 0x3ce   :  { %v2506_v61 = vsel %vm106_vm1, %v2505_v47, 0.2 }
 0x3cf   :  { %2508 = vst.msk [vmem:[#allocation7] sm:$0xff] %vm2507_vm15, %v2506_v61 }
 0x3d0   :  { %3346 = shalt.err (!%p3343_p0)
}
 0x3d1   :  { %2518 = dma.vmem_to_hbm [thread:$0]  %s2516_s25, 128, %s3606_s9, [#allocation4]  }
 0x3d2   :  { %3359 = dma.done.wait [#allocation4], 128  }
 0x3d3   :  { %3360 = vsyncadd [#allocation4], 4294967168 }
 0x3d4   :  { %2522 = vsyncpa [#allocation3], 1 }
 0x3d5   :  { %2523 = vsyncpa [#allocation6], 1 }
 0x3d6   :  { %2524 = vsyncpa [#allocation4], 1 }

</bundles_post_ra>
